<compile_context>
chip_gen: v7x
topology: tpu7x:2x2x1
jax: 0.10.0
libtpu: 0.0.40
codegen_flags: <defaults>
</compile_context>

<pallas_src>
import jax
import jax.numpy as jnp
from jax.experimental import pallas as pl
from jax.experimental.pallas import tpu as pltpu

ALPHA = 0.1
INV_ALPHA = 1.0 / ALPHA  # multiply instead of divide inside the kernel


def _celu(x):
    # torch.where(x > 0, x, alpha * (exp(x / alpha) - 1)), with the exp
    # argument clamped so the untaken branch never overflows to inf.
    return jnp.where(
        x > 0,
        x,
        ALPHA * (jnp.exp(jnp.minimum(x, 0.0) * INV_ALPHA) - 1.0),
    )


def atomic_network_kernel(x_ref,
                          w1_ref, b1_ref,
                          w2_ref, b2_ref,
                          w3_ref, b3_ref,
                          w4_ref, b4_ref,
                          o_ref):
    cdt = w1_ref.dtype  # MXU operand dtype (f32 or bf16); accumulation is f32.

    x = x_ref[...]                                                   # (tm, 384)

    h = jnp.dot(x, w1_ref[...], preferred_element_type=jnp.float32) + b1_ref[...]
    h = _celu(h)                                                     # (tm, 128)

    h = jnp.dot(h.astype(cdt), w2_ref[...],
                preferred_element_type=jnp.float32) + b2_ref[...]
    h = _celu(h)                                                     # (tm, 128)

    h = jnp.dot(h.astype(cdt), w3_ref[...],
                preferred_element_type=jnp.float32) + b3_ref[...]
    h = _celu(h)                                                     # (tm, 64)

    # Final 64 -> 1 projection.  Contract the feature dim of BOTH operands
    # ((1,),(1,)) so the result is produced lane-major: (1,64) x (tm,64) ->
    # (1, tm).  This feeds a lane-dense, unmasked store of the output row.
    y = jax.lax.dot_general(
        w4_ref[...], h.astype(cdt),
        dimension_numbers=(((1,), (1,)), ((), ())),
        preferred_element_type=jnp.float32)                          # (1, tm)

    o_ref[...] = (y + b4_ref[...]).astype(o_ref.dtype)


def atomic_network_forward(aev, params, *, tm=512,
                           compute_dtype=jnp.float32,
                           vmem_limit_bytes=None):
    """aev: (N, 384) float32.  Returns (N, 1) float32.

    tm: atom tile (multiple of 128); sweep 512..2048 for large N.
    compute_dtype: jnp.bfloat16 recommended on v6e / v7x (f32 accumulation).
    """
    N, D = aev.shape
    assert D == 384

    # Tile choice: multiple of 128, at most `tm`, and small enough that any
    # N > 128 gets >= 2 grid steps (both v7x TensorCores receive work).
    tm = pl.cdiv(min(int(tm), pl.cdiv(N, 2)), 128) * 128
    n_pad = pl.cdiv(N, tm) * tm
    num_tiles = n_pad // tm

    x = aev
    if n_pad != N:
        x = jnp.pad(x, ((0, n_pad - N), (0, 0)))
    x = x.astype(compute_dtype)

    # Weights stored as (in, out): kernel computes y = x @ W + b.
    w1 = params["w1"].astype(compute_dtype)   # (384, 128)
    w2 = params["w2"].astype(compute_dtype)   # (128, 128)
    w3 = params["w3"].astype(compute_dtype)   # (128,  64)
    w4t = params["w4"].T.astype(compute_dtype)  # (1, 64)  (out, in) row
    b1, b2, b3, b4 = params["b1"], params["b2"], params["b3"], params["b4"]

    # Constant index maps: block index never changes, so Pallas DMAs each
    # weight/bias into VMEM once and keeps it resident across all grid steps.
    resident = lambda arr: pl.BlockSpec(arr.shape, lambda i: (0, 0))

    out = pl.pallas_call(
        atomic_network_kernel,
        out_shape=jax.ShapeDtypeStruct((1, n_pad), jnp.float32),
        grid_spec=pltpu.PrefetchScalarGridSpec(
            num_scalar_prefetch=0,
            grid=(num_tiles,),
            in_specs=[
                pl.BlockSpec((tm, 384), lambda i: (i, 0)),   # aev tile
                resident(w1), resident(b1),
                resident(w2), resident(b2),
                resident(w3), resident(b3),
                resident(w4t), resident(b4),
            ],
            out_specs=pl.BlockSpec((1, tm), lambda i: (0, i)),  # lane-dense row
        ),
        compiler_params=pltpu.CompilerParams(
            dimension_semantics=("parallel",),
            vmem_limit_bytes=vmem_limit_bytes),
    )(x, w1, b1, w2, b2, w3, b3, w4t, b4)

    return out[0, :N].reshape(N, 1)


def init_params(key):
    """Deterministic synthetic parameters matching AtomicNetwork layer shapes."""
    sizes = [(384, 128), (128, 128), (128, 64), (64, 1)]
    params = {}
    for idx, (fan_in, fan_out) in enumerate(sizes, start=1):
        key, kw, kb = jax.random.split(key, 3)
        bound = 1.0 / jnp.sqrt(fan_in)  # torch.nn.Linear default uniform bound
        params[f"w{idx}"] = jax.random.uniform(
            kw, (fan_in, fan_out), jnp.float32, -bound, bound)
        params[f"b{idx}"] = jax.random.uniform(
            kb, (1, fan_out), jnp.float32, -bound, bound)
    return params


def reference_forward(aev, params):
    h = aev
    for idx in range(1, 5):
        h = h @ params[f"w{idx}"] + params[f"b{idx}"]
        if idx < 4:
            h = _celu(h)
    return h


if __name__ == "__main__":
    key = jax.random.PRNGKey(0)
    key, kx = jax.random.split(key)

    # Deliberately not a multiple of the tile: exercises padding + 2 grid steps.
    num_atoms = 200
    aev = jax.random.normal(kx, (num_atoms, 384), jnp.float32)
    params = init_params(key)

    ref = reference_forward(aev, params)

    # f32 path (exact vs reference).
    out = jax.block_until_ready(atomic_network_forward(aev, params, tm=128))
    assert out.shape == (num_atoms, 1)
    assert jnp.allclose(out, ref, atol=1e-4, rtol=1e-4), "f32 mismatch vs reference"

    # bf16 MXU-input path (the v6e / v7x recommendation); looser tolerance.
    out_bf16 = jax.block_until_ready(
        atomic_network_forward(aev, params, tm=128, compute_dtype=jnp.bfloat16))
    assert out_bf16.shape == (num_atoms, 1)
    assert jnp.allclose(out_bf16, ref, atol=0.1, rtol=0.1), "bf16 mismatch vs reference"

    print("KERNEL_OK")
</pallas_src>

<mosaic_0001>
module attributes {stable_mosaic.version = 11 : i64} {
  func.func @atomic_network_kernel(%arg0: i32, %arg1: memref<128x384xf32, #tpu.memory_space<vmem>>, %arg2: memref<384x128xf32, #tpu.memory_space<vmem>>, %arg3: memref<1x128xf32, #tpu.memory_space<vmem>>, %arg4: memref<128x128xf32, #tpu.memory_space<vmem>>, %arg5: memref<1x128xf32, #tpu.memory_space<vmem>>, %arg6: memref<128x64xf32, #tpu.memory_space<vmem>>, %arg7: memref<1x64xf32, #tpu.memory_space<vmem>>, %arg8: memref<1x64xf32, #tpu.memory_space<vmem>>, %arg9: memref<1x1xf32, #tpu.memory_space<vmem>>, %arg10: memref<1x128xf32, #tpu.memory_space<vmem>>) attributes {dimension_semantics = [#tpu.dimension_semantics<parallel>], iteration_bounds = array<i64: 2>, scalar_prefetch = 0 : i64, scratch_operands = 0 : i64, tpu.core_type = #tpu.core_type<tc>, window_params = [{transform_indices = @transform_0, window_bounds = array<i64: 128, 384>}, {pipeline_mode = #tpu.pipeline_mode<synchronous>, transform_indices = @transform_1, window_bounds = array<i64: 384, 128>}, {pipeline_mode = #tpu.pipeline_mode<synchronous>, transform_indices = @transform_2, window_bounds = array<i64: 1, 128>}, {pipeline_mode = #tpu.pipeline_mode<synchronous>, transform_indices = @transform_3, window_bounds = array<i64: 128, 128>}, {pipeline_mode = #tpu.pipeline_mode<synchronous>, transform_indices = @transform_4, window_bounds = array<i64: 1, 128>}, {pipeline_mode = #tpu.pipeline_mode<synchronous>, transform_indices = @transform_5, window_bounds = array<i64: 128, 64>}, {pipeline_mode = #tpu.pipeline_mode<synchronous>, transform_indices = @transform_6, window_bounds = array<i64: 1, 64>}, {pipeline_mode = #tpu.pipeline_mode<synchronous>, transform_indices = @transform_7, window_bounds = array<i64: 1, 64>}, {pipeline_mode = #tpu.pipeline_mode<synchronous>, transform_indices = @transform_8, window_bounds = array<i64: 1, 1>}, {transform_indices = @transform_9, window_bounds = array<i64: 1, 128>}]} {
    %c0 = arith.constant 0 : index
    %c0_0 = arith.constant 0 : index
    %0 = vector.load %arg1[%c0, %c0_0] : memref<128x384xf32, #tpu.memory_space<vmem>>, vector<128x384xf32>
    %c0_1 = arith.constant 0 : index
    %c0_2 = arith.constant 0 : index
    %1 = vector.load %arg2[%c0_1, %c0_2] : memref<384x128xf32, #tpu.memory_space<vmem>>, vector<384x128xf32>
    %cst = arith.constant dense<0.000000e+00> : vector<128x128xf32>
    %2 = tpu.matmul %0, %1, %cst {dimension_numbers = #tpu.dot_dimension_numbers<[1], [0], [0], [1], [0, 0, 1, 1], [], []>} : vector<128x384xf32>, vector<384x128xf32>, vector<128x128xf32> -> vector<128x128xf32>
    %c0_3 = arith.constant 0 : index
    %c0_4 = arith.constant 0 : index
    %3 = vector.load %arg3[%c0_3, %c0_4] : memref<1x128xf32, #tpu.memory_space<vmem>>, vector<1x128xf32>
    %4 = vector.broadcast %3 : vector<1x128xf32> to vector<128x128xf32>
    %5 = arith.addf %2, %4 : vector<128x128xf32>
    %cst_5 = arith.constant 0.000000e+00 : f32
    %6 = vector.broadcast %cst_5 : f32 to vector<128x128xf32>
    %7 = arith.cmpf ogt, %5, %6 : vector<128x128xf32>
    %cst_6 = arith.constant 0.000000e+00 : f32
    %8 = vector.broadcast %cst_6 : f32 to vector<128x128xf32>
    %9 = arith.minimumf %5, %8 : vector<128x128xf32>
    %cst_7 = arith.constant 1.000000e+01 : f32
    %10 = vector.broadcast %cst_7 : f32 to vector<128x128xf32>
    %11 = arith.mulf %9, %10 : vector<128x128xf32>
    %12 = math.exp %11 : vector<128x128xf32>
    %cst_8 = arith.constant 1.000000e+00 : f32
    %13 = vector.broadcast %cst_8 : f32 to vector<128x128xf32>
    %14 = arith.subf %12, %13 : vector<128x128xf32>
    %cst_9 = arith.constant 1.000000e-01 : f32
    %15 = vector.broadcast %cst_9 : f32 to vector<128x128xf32>
    %16 = arith.mulf %15, %14 : vector<128x128xf32>
    %17 = arith.select %7, %5, %16 : vector<128x128xi1>, vector<128x128xf32>
    %c0_10 = arith.constant 0 : index
    %c0_11 = arith.constant 0 : index
    %18 = vector.load %arg4[%c0_10, %c0_11] : memref<128x128xf32, #tpu.memory_space<vmem>>, vector<128x128xf32>
    %cst_12 = arith.constant dense<0.000000e+00> : vector<128x128xf32>
    %19 = tpu.matmul %17, %18, %cst_12 {dimension_numbers = #tpu.dot_dimension_numbers<[1], [0], [0], [1], [0, 0, 1, 1], [], []>} : vector<128x128xf32>, vector<128x128xf32>, vector<128x128xf32> -> vector<128x128xf32>
    %c0_13 = arith.constant 0 : index
    %c0_14 = arith.constant 0 : index
    %20 = vector.load %arg5[%c0_13, %c0_14] : memref<1x128xf32, #tpu.memory_space<vmem>>, vector<1x128xf32>
    %21 = vector.broadcast %20 : vector<1x128xf32> to vector<128x128xf32>
    %22 = arith.addf %19, %21 : vector<128x128xf32>
    %cst_15 = arith.constant 0.000000e+00 : f32
    %23 = vector.broadcast %cst_15 : f32 to vector<128x128xf32>
    %24 = arith.cmpf ogt, %22, %23 : vector<128x128xf32>
    %cst_16 = arith.constant 0.000000e+00 : f32
    %25 = vector.broadcast %cst_16 : f32 to vector<128x128xf32>
    %26 = arith.minimumf %22, %25 : vector<128x128xf32>
    %cst_17 = arith.constant 1.000000e+01 : f32
    %27 = vector.broadcast %cst_17 : f32 to vector<128x128xf32>
    %28 = arith.mulf %26, %27 : vector<128x128xf32>
    %29 = math.exp %28 : vector<128x128xf32>
    %cst_18 = arith.constant 1.000000e+00 : f32
    %30 = vector.broadcast %cst_18 : f32 to vector<128x128xf32>
    %31 = arith.subf %29, %30 : vector<128x128xf32>
    %cst_19 = arith.constant 1.000000e-01 : f32
    %32 = vector.broadcast %cst_19 : f32 to vector<128x128xf32>
    %33 = arith.mulf %32, %31 : vector<128x128xf32>
    %34 = arith.select %24, %22, %33 : vector<128x128xi1>, vector<128x128xf32>
    %c0_20 = arith.constant 0 : index
    %c0_21 = arith.constant 0 : index
    %35 = vector.load %arg6[%c0_20, %c0_21] : memref<128x64xf32, #tpu.memory_space<vmem>>, vector<128x64xf32>
    %cst_22 = arith.constant dense<0.000000e+00> : vector<128x64xf32>
    %36 = tpu.matmul %34, %35, %cst_22 {dimension_numbers = #tpu.dot_dimension_numbers<[1], [0], [0], [1], [0, 0, 1, 1], [], []>} : vector<128x128xf32>, vector<128x64xf32>, vector<128x64xf32> -> vector<128x64xf32>
    %c0_23 = arith.constant 0 : index
    %c0_24 = arith.constant 0 : index
    %37 = vector.load %arg7[%c0_23, %c0_24] : memref<1x64xf32, #tpu.memory_space<vmem>>, vector<1x64xf32>
    %38 = vector.broadcast %37 : vector<1x64xf32> to vector<128x64xf32>
    %39 = arith.addf %36, %38 : vector<128x64xf32>
    %cst_25 = arith.constant 0.000000e+00 : f32
    %40 = vector.broadcast %cst_25 : f32 to vector<128x64xf32>
    %41 = arith.cmpf ogt, %39, %40 : vector<128x64xf32>
    %cst_26 = arith.constant 0.000000e+00 : f32
    %42 = vector.broadcast %cst_26 : f32 to vector<128x64xf32>
    %43 = arith.minimumf %39, %42 : vector<128x64xf32>
    %cst_27 = arith.constant 1.000000e+01 : f32
    %44 = vector.broadcast %cst_27 : f32 to vector<128x64xf32>
    %45 = arith.mulf %43, %44 : vector<128x64xf32>
    %46 = math.exp %45 : vector<128x64xf32>
    %cst_28 = arith.constant 1.000000e+00 : f32
    %47 = vector.broadcast %cst_28 : f32 to vector<128x64xf32>
    %48 = arith.subf %46, %47 : vector<128x64xf32>
    %cst_29 = arith.constant 1.000000e-01 : f32
    %49 = vector.broadcast %cst_29 : f32 to vector<128x64xf32>
    %50 = arith.mulf %49, %48 : vector<128x64xf32>
    %51 = arith.select %41, %39, %50 : vector<128x64xi1>, vector<128x64xf32>
    %c0_30 = arith.constant 0 : index
    %c0_31 = arith.constant 0 : index
    %52 = vector.load %arg8[%c0_30, %c0_31] : memref<1x64xf32, #tpu.memory_space<vmem>>, vector<1x64xf32>
    %cst_32 = arith.constant dense<0.000000e+00> : vector<1x128xf32>
    %53 = tpu.matmul %52, %51, %cst_32 {dimension_numbers = #tpu.dot_dimension_numbers<[1], [1], [0], [0], [0, 0, 1, 0], [], []>} : vector<1x64xf32>, vector<128x64xf32>, vector<1x128xf32> -> vector<1x128xf32>
    %c0_33 = arith.constant 0 : index
    %c0_34 = arith.constant 0 : index
    %54 = vector.load %arg9[%c0_33, %c0_34] : memref<1x1xf32, #tpu.memory_space<vmem>>, vector<1x1xf32>
    %55 = vector.broadcast %54 : vector<1x1xf32> to vector<1x128xf32>
    %56 = arith.addf %53, %55 : vector<1x128xf32>
    %c0_35 = arith.constant 0 : index
    %c0_36 = arith.constant 0 : index
    %57 = vector.load %arg10[%c0_35, %c0_36] : memref<1x128xf32, #tpu.memory_space<vmem>>, vector<1x128xf32>
    tpu.vector_store %arg10[%c0_35, %c0_36], %56 {strides = array<i32>} : memref<1x128xf32, #tpu.memory_space<vmem>>, vector<1x128xf32>,
    return
  }
  func.func @transform_0(%arg0: i32) -> (i32, i32) {
    %c0_i32 = arith.constant 0 : i32
    %c0_i32_0 = arith.constant 0 : i32
    return %arg0, %c0_i32 : i32, i32
  }
  func.func @transform_1(%arg0: i32) -> (i32, i32) {
    %c0_i32 = arith.constant 0 : i32
    %c0_i32_0 = arith.constant 0 : i32
    %c0_i32_1 = arith.constant 0 : i32
    return %c0_i32, %c0_i32_0 : i32, i32
  }
  func.func @transform_2(%arg0: i32) -> (i32, i32) {
    %c0_i32 = arith.constant 0 : i32
    %c0_i32_0 = arith.constant 0 : i32
    %c0_i32_1 = arith.constant 0 : i32
    return %c0_i32, %c0_i32_0 : i32, i32
  }
  func.func @transform_3(%arg0: i32) -> (i32, i32) {
    %c0_i32 = arith.constant 0 : i32
    %c0_i32_0 = arith.constant 0 : i32
    %c0_i32_1 = arith.constant 0 : i32
    return %c0_i32, %c0_i32_0 : i32, i32
  }
  func.func @transform_4(%arg0: i32) -> (i32, i32) {
    %c0_i32 = arith.constant 0 : i32
    %c0_i32_0 = arith.constant 0 : i32
    %c0_i32_1 = arith.constant 0 : i32
    return %c0_i32, %c0_i32_0 : i32, i32
  }
  func.func @transform_5(%arg0: i32) -> (i32, i32) {
    %c0_i32 = arith.constant 0 : i32
    %c0_i32_0 = arith.constant 0 : i32
    %c0_i32_1 = arith.constant 0 : i32
    return %c0_i32, %c0_i32_0 : i32, i32
  }
  func.func @transform_6(%arg0: i32) -> (i32, i32) {
    %c0_i32 = arith.constant 0 : i32
    %c0_i32_0 = arith.constant 0 : i32
    %c0_i32_1 = arith.constant 0 : i32
    return %c0_i32, %c0_i32_0 : i32, i32
  }
  func.func @transform_7(%arg0: i32) -> (i32, i32) {
    %c0_i32 = arith.constant 0 : i32
    %c0_i32_0 = arith.constant 0 : i32
    %c0_i32_1 = arith.constant 0 : i32
    return %c0_i32, %c0_i32_0 : i32, i32
  }
  func.func @transform_8(%arg0: i32) -> (i32, i32) {
    %c0_i32 = arith.constant 0 : i32
    %c0_i32_0 = arith.constant 0 : i32
    %c0_i32_1 = arith.constant 0 : i32
    return %c0_i32, %c0_i32_0 : i32, i32
  }
  func.func @transform_9(%arg0: i32) -> (i32, i32) {
    %c0_i32 = arith.constant 0 : i32
    %c0_i32_0 = arith.constant 0 : i32
    return %c0_i32, %arg0 : i32, i32
  }
}

</mosaic_0001>

<bundles_post_ra>
// kernel: tpu_custom_call.1
= control target key start
LH: loop header
LB: loop body
LE: loop exit
PB: predicated region body
PF: predicated region fallthrough
CT: control target
= control target key end

     0   :  { %s3325_s0 = inlined_call_operand.hbm [shape: f32[256,384], index: 0, kind: input, shape index: {}]   ;;  %s3326_s1 = inlined_call_operand.hbm [shape: f32[384,128], index: 1, kind: input, shape index: {}]   ;;  %s3327_s2 = inlined_call_operand.vmem [shape: f32[1,128], index: 2, kind: input, shape index: {}]   ;;  %s3328_s3 = inlined_call_operand.vmem [shape: f32[128,128], index: 3, kind: input, shape index: {}]   ;;  %s3329_s4 = inlined_call_operand.vmem [shape: f32[1,128], index: 4, kind: input, shape index: {}]   ;;  %s3330_s5 = inlined_call_operand.vmem [shape: f32[128,64], index: 5, kind: input, shape index: {}]   ;;  %s3331_s6 = inlined_call_operand.vmem [shape: f32[1,64], index: 6, kind: input, shape index: {}]   ;;  %s3332_s7 = inlined_call_operand.vmem [shape: f32[1,64], index: 7, kind: input, shape index: {}]   ;;  %s3333_s8 = inlined_call_operand.<no memory space> [shape: f32[1,1], index: 8, kind: input, shape index: {}]   ;;  %s3334_s9 = inlined_call_operand.hbm [shape: f32[1,256], index: 9, kind: output, shape index: {}]  }
   0x1   :  { %3340 = sst [smem:[#allocation13_spill]] %s3326_s1  ;;  %v14_v0 = vstv %s3333_s8 }
   0x2   :  { %15 = vst [vmem:[#allocation2] sm:$0x1] %v14_v0 }
   0x3   :  { %16 = vsyncpa [#allocation4], 0 }
   0x4   :  { %18 = vsyncpa [#allocation4 + $0x1], 0 }
   0x5   :  { %19 = vsyncpa [#allocation7], 0 }
   0x6   :  { %20 = vsyncpa [#allocation5], 0 }
   0x7   :  { %22 = vsyncpa [#allocation5 + $0x1], 0  ;;  %s2700_s11 = smov 0   ;;  %s2702_s12 = smov 0  }
   0x8   :  { %s2704_s13 = smov 0   ;;  %s2706_s14 = smov 0  }
   0x9 LB: > { %s2721_s8 = sadd.s32 4294967295, %s2634_s14   ;;  %s1705_s15 = sadd.s32 4294967294, %s2634_s14   ;;  %s2634_s14 = sphi %s2706_s14, %s3358_s14   ;;  %s2630_s13 = sphi %s2704_s13, %s3361_s13   ;;  %s2626_s12 = sphi %s2702_s12, %s3360_s12   ;;  %s2622_s11 = sphi %s2700_s11, %s3359_s11  }
   0xa   : > { %p48_p0 = scmp.ne.s32.totalorder %s2626_s12, %s2622_s11  ;;  %p3335_p1 = scmp.eq.s32.totalorder %s2721_s8, 0 }
   0xb   : > { %p246_p3 = scmp.eq.s32.totalorder %s1705_s15, 1  ;;  %p1706_p5 = scmp.ge.s32.totalorder %s2634_s14, 1 }
   0xc   : > { %p2730_p4 = por %p3335_p1, %p48_p0  ;;  %p253_p7 = scmp.lt.s32.totalorder %s2634_s14, 3 }
   0xd   : > { %p2735_p6 = por %p246_p3, %p48_p0  ;;  %s2636_s19 = smov [#allocation6]  }
   0xe   : > { %s3341_s16 = scalar_select %p2730_p4, 1, 0 }
   0xf   : > { %s3342_s17 = scalar_select %p2735_p6, 1, 0 }
  0x10   : > { %p2740_p8 = pnand %p1706_p5, %p253_p7  ;;  %s265_s20 = sshll.u32 %s2636_s19, 4  ;;  %s2744_s20 = int_to_ptr.vmem [resolvable:$true] %s265_s20 }
  0x11   : > { %s2756_s22 = sadd.s32 1, %s2634_s14   ;;  %s35_s23 = sadd.s32 1, %s2630_s13 }
  0x12   : > { %s3343_s18 = scalar_select %p2740_p8, 1, 0 }
  0x13   : > { %p2352_p9 = pneg %p2740_p8  ;;  %3345 = sst [smem:[#allocation12_spill]] %s2756_s22 }
  0x14   : > { %s32_s24 = ssub.s32 %s2634_s14, %s2756_s22  ;;  %s3346_s1 = sld [smem:[#allocation13_spill]] }
  0x15   : > { %p2751_p11 = pnand %p2352_p9, %p3335_p1 }
  0x17   : > { %p2508_p13 = pneg %p2751_p11 }
  0x1a   : > { %s2506_s27 = scalar_lea.hbm %s3346_s1, 6144 }
  0x1b   : > { %p2507_p12 = scmp.ne.s32.totalorder %s3346_s1, %s2506_s27  ;;  %p2513_p5 = scmp.lt.u32.totalorder %s2506_s27, %s3346_s1 }
  0x1d   : > { %p2509_p0 = pnand %p2508_p13, %p2507_p12 }
  0x1f   : > { %p2510_p3 = pneg %p2509_p0 }
  0x21   : > { %p2515_p7 = pnand %p2513_p5, %p2510_p3 }
  0x23   : > { %2518 = shalt.err (!%p2515_p7)
}
  0x24   : > { %s2519_s15 = scalar_lea.vmem %s2744_s20, 6144  ;;  %p2527_p2 = scmp.lt.s32.totalorder %s2744_s20, %s2744_s20 }
  0x25   : > { %p2520_p9 = scmp.ne.s32.totalorder %s2744_s20, %s2519_s15  ;;  %p2528_p6 = scmp.lt.s32.totalorder %s2519_s15, %s2519_s15 }
  0x27   : > { %p2522_p10 = pnand %p2520_p9, %p2508_p13  ;;  %p2529_p4 = por %p2528_p6, %p2527_p2 }
  0x29   : > { %p2523_p1 = pneg %p2522_p10 }
  0x2b   : > { %p2530_p8 = pnand %p2529_p4, %p2523_p1 }
  0x2d   : > { %2533 = shalt.err (!%p2530_p8)
}
  0x2e   : > { %s2637_s19 = smov 128   ;;  %s2638_s25 = smov 8  }
  0x2f   : > { %2355 = dma.hbm_to_vmem [thread:$0]  (!%p2751_p11), %s3346_s1, 6144, %s2744_s20, [#allocation7], %s2637_s19, %s2637_s19, %s2638_s25  }
  0x30   : > { %p33_p2 = scmp.eq.s32.totalorder %s32_s24, 0  ;;  %p42_p1 = scmp.ne.s32.totalorder %s2630_s13, %s2626_s12 }
  0x31   : > { %p43_p4 = scmp.eq.s32.totalorder %s2634_s14, 0  ;;  %p2365_p6 = scmp.lt.s32.totalorder %s2634_s14, 2 }
  0x32   : > { %s2787_s28 = scalar_select %p33_p2, %s2630_s13, %s35_s23  }
  0x33   : > { %p44_p8 = por %p43_p4, %p42_p1  ;;  %p3347_p10 = scmp.eq.s32.totalorder %s2721_s8, 1 }
  0x34   : > { %s300_s30 = sand.u32 1, %s2630_s13   ;;  %s2342_s10 = smul.u32 6144, %s2634_s14 }
  0x35   : > { %p2791_p12 = por %p3347_p10, %p42_p1  ;;  %s2341_s15 = smul.u32 384, %s300_s30 }
  0x36   : > { %s2800_s26 = scalar_lea.hbm %s3325_s0, %s2342_s10  ;;  %p2802_p11 = pnand %p2365_p6, %p44_p8 }
  0x37   : > { %s304_s23 = scalar_lea.vmem [#allocation3], %s2341_s15  ;;  %s2808_s19 = scalar_lea.sflag [#allocation4], %s300_s30 }
  0x38   : > { %s312_s24 = sshll.u32 %s304_s23, 4  ;;  %s2534_s25 = scalar_lea.hbm %s2800_s26, 6144  ;;  %s2806_s24 = int_to_ptr.vmem [resolvable:$true] %s312_s24 }
  0x39   : > { %p2535_p13 = scmp.ne.s32.totalorder %s2800_s26, %s2534_s25  ;;  %p2536_p0 = pneg %p2802_p11 }
  0x3a   : > { %s2539_s10 = scalar_lea.hbm %s3325_s0, 12288  ;;  %p2540_p7 = scmp.lt.u32.totalorder %s2800_s26, %s3325_s0 }
  0x3b   : > { %p2537_p3 = pnand %p2536_p0, %p2535_p13  ;;  %p2541_p9 = scmp.lt.u32.totalorder %s2539_s10, %s2534_s25 }
  0x3c   : > { %p2543_p1 = scmp.lt.u32.totalorder %s2534_s25, %s2800_s26 }
  0x3d   : > { %p2538_p5 = pneg %p2537_p3  ;;  %p2542_p2 = por %p2541_p9, %p2540_p7 }
  0x3f   : > { %p2544_p4 = por %p2543_p1, %p2542_p2 }
  0x41   : > { %p2545_p6 = pnand %p2544_p4, %p2538_p5 }
  0x43   : > { %2548 = shalt.err (!%p2545_p6)
}
  0x44   : > { %s2549_s30 = scalar_lea.vmem %s2806_s24, 6144  ;;  %s2639_s15 = smov [#allocation3]  }
  0x45   : > { %p2550_p8 = scmp.ne.s32.totalorder %s2806_s24, %s2549_s30  ;;  %s2554_s23 = sshll.u32 %s2639_s15, 4  ;;  %s2555_s23 = int_to_ptr.vmem [resolvable:$false] %s2554_s23 }
  0x46   : > { %s2556_s1 = scalar_lea.vmem %s2555_s23, 12288  ;;  %p2557_p3 = scmp.lt.s32.totalorder %s2806_s24, %s2555_s23 }
  0x47   : > { %p2552_p10 = pnand %p2550_p8, %p2536_p0  ;;  %p2558_p7 = scmp.lt.s32.totalorder %s2556_s1, %s2549_s30 }
  0x49   : > { %p2553_p13 = pneg %p2552_p10  ;;  %p2559_p9 = por %p2558_p7, %p2557_p3 }
  0x4b   : > { %p2560_p2 = pnand %p2559_p9, %p2553_p13 }
  0x4d   : > { %2563 = shalt.err (!%p2560_p2)
}
  0x4e   : > { %s2640_s25 = smov 384   ;;  %s2641_s22 = smov 24  }
  0x4f   : > { %2359 = dma.hbm_to_vmem [thread:$0]  (!%p2802_p11), %s2800_s26, 6144, %s2806_s24, %s2808_s19, %s2640_s25, %s2640_s25, %s2641_s22  }
  0x50   : > { %p3350_p0 = scmp.ne.s32.totalorder %s3343_s18, 0 }
  0x51   : > { %s2839_s27 = sand.u32 (!%p3350_p0), 1, %s2626_s12   ;;  %p3351_p5 = scmp.ne.s32.totalorder (!%p3350_p0), %s3341_s16, 0 }
  0x52   : > { %324 = sbr.rel (%p3350_p0) target bundleno = 1141 (0x475), region = 56  ;;  %s327_s21 = scalar_lea.sflag (!%p3350_p0), [#allocation4], %s2839_s27 }
  0x53   : > { %s2343_s10 = smul.u32 (!%p3350_p0), 384, %s2839_s27 }
  0x55   : > { %s2843_s30 = scalar_lea.vmem (!%p3350_p0), [#allocation3], %s2343_s10 }
  0x59   : > { %2609 = dma.done.wait (%p3351_p5), %s327_s21, 6144  }
  0x5a   : > { %2611 = vsyncadd (%p3351_p5), %s327_s21, 4294961152  ;;  %p3352_p11 = scmp.eq.s32.totalorder %s2721_s8, 0 }
  0x5c   : > { %2613 = dma.done.wait (%p3352_p11), [#allocation7], 6144   ;;  %p3353_p1 = pmov %p3352_p11 }
  0x5d   : > { %v433_v1 = vld [vmem:[#allocation6 + $0x80] sm:$0xff]  ;;  %v434_v2 = vld [vmem:[#allocation6 + $0x88] sm:$0xff]  ;;  %v435_v6 = vld [vmem:[#allocation6 + $0x90] sm:$0xff]  ;;  %s1782_s26 = sshll.u32 %s2721_s8, 4  ;;  %s367_s20 = scalar_lea.vmem [#allocation8], %s2839_s27 }
  0x5e   : > { %2615 = vsyncadd (%p3353_p1), [#allocation7], 4294961152  ;;  %v417_v3 = vld [vmem:[#allocation6] sm:$0xff]  ;;  %v2181_v4 = vpack.c.bf16 %v434_v2, %v433_v1  ;;  %v418_v5 = vld [vmem:[#allocation6 + $0x8] sm:$0xff]  ;;  %s1629_s24 = sshll.u32 %s367_s20, 4  ;;  %s3281_s23 = scalar_lea.hbm %s3334_s9, %s1782_s26  ;;  %s3283_s24 = int_to_ptr.vmem [resolvable:$true] %s1629_s24 }
  0x5f   : > { %v436_v7 = vld [vmem:[#allocation6 + $0x98] sm:$0xff]  ;;  %v2183_v8 = vpack.c.bf16 %v418_v5, %v417_v3  ;;  %v449_v10 = vld [vmem:[#allocation6 + $0x100] sm:$0xff]  ;;  %v450_v11 = vld [vmem:[#allocation6 + $0x108] sm:$0xff]  ;;  %s1617_s1 = scalar_lea.sflag [#allocation5], %s2839_s27  ;;  %s2564_s25 = scalar_lea.vmem %s3283_s24, 16 }
  0x60   : > { %v2185_v9 = vpack.c.bf16 %v436_v7, %v435_v6  ;;  %v419_v12 = vld [vmem:[#allocation6 + $0x10] sm:$0xff]  ;;  %2182 = vmatprep.subr.bf16.mxu0 %v2181_v4  ;;  %v2213_v13 = vpack.c.bf16 %v450_v11, %v449_v10  ;;  %v420_v14 = vld [vmem:[#allocation6 + $0x18] sm:$0xff]  ;;  %v437_v15 = vld [vmem:[#allocation6 + $0xa0] sm:$0xff]  ;;  %p2565_p4 = scmp.ne.s32.totalorder %s3283_s24, %s2564_s25  ;;  %s2646_s8 = smov [#allocation8]  }
  0x61   : > { %v438_v16 = vld [vmem:[#allocation6 + $0xa8] sm:$0xff]  ;;  %2184 = vmatpush3.bf16.msra.mxu0 %v2183_v8  ;;  %v2187_v17 = vpack.c.bf16 %v420_v14, %v419_v12  ;;  %v451_v18 = vld [vmem:[#allocation6 + $0x110] sm:$0xff]  ;;  %v452_v19 = vld [vmem:[#allocation6 + $0x118] sm:$0xff]  ;;  %s2568_s22 = sshll.u32 %s2646_s8, 4  ;;  %s2569_s22 = int_to_ptr.vmem [resolvable:$false] %s2568_s22 }
  0x62   : > { %2186 = vmatprep.subr.bf16.mxu0 %v2185_v9  ;;  %2214 = vmatprep.subr.bf16.mxu1 %v2213_v13  ;;  %v2189_v20 = vpack.c.bf16 %v438_v16, %v437_v15  ;;  %v2217_v21 = vpack.c.bf16 %v452_v19, %v451_v18  ;;  %v421_v22 = vld [vmem:[#allocation6 + $0x20] sm:$0xff]  ;;  %v422_v23 = vld [vmem:[#allocation6 + $0x28] sm:$0xff]  ;;  %v439_v24 = vld [vmem:[#allocation6 + $0xb0] sm:$0xff]  ;;  %p2566_p6 = pnand %p2565_p4, %p2791_p12  ;;  %s2570_s10 = scalar_lea.vmem %s2569_s22, 32 }
  0x63   : > { %2216 = vmatpush3.bf16.msra.mxu1 %v2213_v13  ;;  %v440_v25 = vld [vmem:[#allocation6 + $0xb8] sm:$0xff]  ;;  %v453_v26 = vld [vmem:[#allocation6 + $0x120] sm:$0xff]  ;;  %v454_v27 = vld [vmem:[#allocation6 + $0x128] sm:$0xff]  ;;  %v2191_v29 = vpack.c.bf16 %v422_v23, %v421_v22  ;;  %p2571_p10 = scmp.lt.s32.totalorder %s3283_s24, %s2569_s22  ;;  %p2572_p13 = scmp.lt.s32.totalorder %s2570_s10, %s2564_s25 }
  0x64   : > { %2218 = vmatprep.subr.bf16.mxu1 %v2217_v21  ;;  %v2221_v28 = vpack.c.bf16 %v454_v27, %v453_v26  ;;  %v455_v30 = vld [vmem:[#allocation6 + $0x130] sm:$0xff]  ;;  %v456_v31 = vld [vmem:[#allocation6 + $0x138] sm:$0xff]  ;;  %v2193_v32 = vpack.c.bf16 %v440_v25, %v439_v24  ;;  %v441_v35 = vld [vmem:[#allocation6 + $0xc0] sm:$0xff]  ;;  %p2567_p8 = pneg %p2566_p6 }
  0x65   : > { %2188 = vmatpush3.bf16.msra.mxu0 %v2187_v17  ;;  %v423_v33 = vld [vmem:[#allocation6 + $0x30] sm:$0xff]  ;;  %v424_v34 = vld [vmem:[#allocation6 + $0x38] sm:$0xff]  ;;  %v442_v36 = vld [vmem:[#allocation6 + $0xc8] sm:$0xff]  ;;  %v2225_v37 = vpack.c.bf16 %v456_v31, %v455_v30  ;;  %p2573_p3 = por %p2572_p13, %p2571_p10 }
  0x66   : > { %2190 = vmatprep.subr.bf16.mxu0 %v2189_v20  ;;  %v2195_v38 = vpack.c.bf16 %v424_v34, %v423_v33  ;;  %v457_v39 = vld [vmem:[#allocation6 + $0x140] sm:$0xff]  ;;  %v458_v40 = vld [vmem:[#allocation6 + $0x148] sm:$0xff]  ;;  %v2197_v41 = vpack.c.bf16 %v442_v36, %v441_v35  ;;  %v443_v44 = vld [vmem:[#allocation6 + $0xd0] sm:$0xff] }
  0x67   : > { %2220 = vmatpush3.bf16.msra.mxu1 %v2217_v21  ;;  %v425_v42 = vld [vmem:[#allocation6 + $0x40] sm:$0xff]  ;;  %v426_v43 = vld [vmem:[#allocation6 + $0x48] sm:$0xff]  ;;  %v444_v45 = vld [vmem:[#allocation6 + $0xd8] sm:$0xff]  ;;  %v2229_v46 = vpack.c.bf16 %v458_v40, %v457_v39  ;;  %p2574_p7 = pnand %p2573_p3, %p2567_p8 }
  0x68   : > { %2222 = vmatprep.subr.bf16.mxu1 %v2221_v28  ;;  %v370_v47 = vld [vmem:[%s2843_s30 + $0x8] sm:$0xff]  ;;  %v2199_v48 = vpack.c.bf16 %v426_v43, %v425_v42  ;;  %v459_v49 = vld [vmem:[#allocation6 + $0x150] sm:$0xff]  ;;  %v460_v50 = vld [vmem:[#allocation6 + $0x158] sm:$0xff]  ;;  %v2201_v51 = vpack.c.bf16 %v444_v45, %v443_v44 }
  0x69   : > { %2192 = vmatpush3.bf16.msra.mxu0 %v2191_v29  ;;  %536 = vmatprep.mubr.f32.mxu0 %v370_v47  ;;  %v427_v52 = vld [vmem:[#allocation6 + $0x50] sm:$0xff]  ;;  %v428_v53 = vld [vmem:[#allocation6 + $0x58] sm:$0xff]  ;;  %v445_v55 = vld [vmem:[#allocation6 + $0xe0] sm:$0xff]  ;;  %v2233_v57 = vpack.c.bf16 %v460_v50, %v459_v49 }
  0x6a   : > { %2194 = vmatprep.subr.bf16.mxu0 %v2193_v32  ;;  %v371_v54 = vld [vmem:[%s2843_s30 + $0x10] sm:$0xff]  ;;  %v446_v56 = vld [vmem:[#allocation6 + $0xe8] sm:$0xff]  ;;  %v2203_v58 = vpack.c.bf16 %v428_v53, %v427_v52  ;;  %v461_v59 = vld [vmem:[#allocation6 + $0x160] sm:$0xff] }
  0x6b   : > { %2224 = vmatpush3.bf16.msra.mxu1 %v2221_v28  ;;  %2010 = vmatprep.mubr.f32.mxu1 %v371_v54  ;;  %v462_v60 = vld [vmem:[#allocation6 + $0x168] sm:$0xff]  ;;  %v2205_v61 = vpack.c.bf16 %v446_v56, %v445_v55  ;;  %v429_v62 = vld [vmem:[#allocation6 + $0x60] sm:$0xff]  ;;  %v447_v0 = vld [vmem:[#allocation6 + $0xf0] sm:$0xff] }
  0x6c   : > { %2226 = vmatprep.subr.bf16.mxu1 %v2225_v37  ;;  %v430_v63 = vld [vmem:[#allocation6 + $0x68] sm:$0xff]  ;;  %v448_v1 = vld [vmem:[#allocation6 + $0xf8] sm:$0xff]  ;;  %v2237_v2 = vpack.c.bf16 %v462_v60, %v461_v59  ;;  %v463_v4 = vld [vmem:[#allocation6 + $0x170] sm:$0xff] }
  0x6d   : > { %2196 = vmatpush3.bf16.msra.mxu0 %v2195_v38  ;;  %v2207_v3 = vpack.c.bf16 %v430_v63, %v429_v62  ;;  %v464_v5 = vld [vmem:[#allocation6 + $0x178] sm:$0xff]  ;;  %v2209_v6 = vpack.c.bf16 %v448_v1, %v447_v0  ;;  %v431_v7 = vld [vmem:[#allocation6 + $0x70] sm:$0xff]  ;;  %v369_v11 = vld [vmem:[%s2843_s30] sm:$0xff] }
  0x6e   : > { %2198 = vmatprep.subr.bf16.mxu0 %v2197_v41  ;;  %v432_v8 = vld [vmem:[#allocation6 + $0x78] sm:$0xff]  ;;  %v2241_v9 = vpack.c.bf16 %v464_v5, %v463_v4  ;;  %v373_v12 = vld [vmem:[%s2843_s30 + $0x20] sm:$0xff]  ;;  %v374_v13 = vld [vmem:[%s2843_s30 + $0x28] sm:$0xff] }
  0x6f   : > { %2228 = vmatpush3.bf16.msra.mxu1 %v2225_v37  ;;  %v2211_v10 = vpack.c.bf16 %v432_v8, %v431_v7  ;;  %v377_v14 = vld [vmem:[%s2843_s30 + $0x40] sm:$0xff]  ;;  %v372_v15 = vld [vmem:[%s2843_s30 + $0x18] sm:$0xff]  ;;  %v383_v18 = vld [vmem:[%s2843_s30 + $0x70] sm:$0xff] }
  0x70   : > { %2230 = vmatprep.subr.bf16.mxu1 %v2229_v46  ;;  %v376_v16 = vld [vmem:[%s2843_s30 + $0x38] sm:$0xff]  ;;  %v375_v19 = vld [vmem:[%s2843_s30 + $0x30] sm:$0xff]  ;;  %v386_v21 = vld [vmem:[%s2843_s30 + $0x88] sm:$0xff] }
  0x71   : > { %2200 = vmatpush3.bf16.msra.mxu0 %v2199_v48  ;;  %v380_v17 = vld [vmem:[%s2843_s30 + $0x58] sm:$0xff]  ;;  %v379_v20 = vld [vmem:[%s2843_s30 + $0x50] sm:$0xff]  ;;  %v389_v22 = vld [vmem:[%s2843_s30 + $0xa0] sm:$0xff] }
  0x72   : > { %2202 = vmatprep.subr.bf16.mxu0 %v2201_v51  ;;  %v378_v23 = vld [vmem:[%s2843_s30 + $0x48] sm:$0xff]  ;;  %v392_v25 = vld [vmem:[%s2843_s30 + $0xb8] sm:$0xff]  ;;  %v395_v26 = vld [vmem:[%s2843_s30 + $0xd0] sm:$0xff] }
  0x73   : > { %2232 = vmatpush3.bf16.msra.mxu1 %v2229_v46  ;;  %v382_v24 = vld [vmem:[%s2843_s30 + $0x68] sm:$0xff]  ;;  %v381_v27 = vld [vmem:[%s2843_s30 + $0x60] sm:$0xff]  ;;  %v384_v31 = vld [vmem:[%s2843_s30 + $0x78] sm:$0xff] }
  0x74   : > { %2234 = vmatprep.subr.bf16.mxu1 %v2233_v57  ;;  %v385_v28 = vld [vmem:[%s2843_s30 + $0x80] sm:$0xff]  ;;  %v398_v29 = vld [vmem:[%s2843_s30 + $0xe8] sm:$0xff]  ;;  %v388_v32 = vld [vmem:[%s2843_s30 + $0x98] sm:$0xff] }
  0x75   : > { %2204 = vmatpush3.bf16.msra.mxu0 %v2203_v58  ;;  %v401_v30 = vld [vmem:[%s2843_s30 + $0x100] sm:$0xff]  ;;  %v404_v33 = vld [vmem:[%s2843_s30 + $0x118] sm:$0xff]  ;;  %v407_v34 = vld [vmem:[%s2843_s30 + $0x130] sm:$0xff] }
  0x76   : > { %2206 = vmatprep.subr.bf16.mxu0 %v2205_v61  ;;  %v387_v35 = vld [vmem:[%s2843_s30 + $0x90] sm:$0xff]  ;;  %v410_v37 = vld [vmem:[%s2843_s30 + $0x148] sm:$0xff]  ;;  %v413_v38 = vld [vmem:[%s2843_s30 + $0x160] sm:$0xff] }
  0x77   : > { %2236 = vmatpush3.bf16.msra.mxu1 %v2233_v57  ;;  %v391_v36 = vld [vmem:[%s2843_s30 + $0xb0] sm:$0xff]  ;;  %v390_v39 = vld [vmem:[%s2843_s30 + $0xa8] sm:$0xff]  ;;  %v416_v41 = vld [vmem:[%s2843_s30 + $0x178] sm:$0xff] }
  0x78   : > { %2238 = vmatprep.subr.bf16.mxu1 %v2237_v2  ;;  %v394_v40 = vld [vmem:[%s2843_s30 + $0xc8] sm:$0xff]  ;;  %v393_v42 = vld [vmem:[%s2843_s30 + $0xc0] sm:$0xff]  ;;  %v396_v44 = vld [vmem:[%s2843_s30 + $0xd8] sm:$0xff] }
  0x79   : > { %2208 = vmatpush3.bf16.msra.mxu0 %v2207_v3  ;;  %v397_v43 = vld [vmem:[%s2843_s30 + $0xe0] sm:$0xff]  ;;  %v400_v45 = vld [vmem:[%s2843_s30 + $0xf8] sm:$0xff]  ;;  %v399_v46 = vld [vmem:[%s2843_s30 + $0xf0] sm:$0xff] }
  0x7a   : > { %2210 = vmatprep.subr.bf16.mxu0 %v2209_v6  ;;  %v403_v47 = vld [vmem:[%s2843_s30 + $0x110] sm:$0xff]  ;;  %v402_v48 = vld [vmem:[%s2843_s30 + $0x108] sm:$0xff]  ;;  %v405_v50 = vld [vmem:[%s2843_s30 + $0x120] sm:$0xff] }
  0x7b   : > { %2240 = vmatpush3.bf16.msra.mxu1 %v2237_v2  ;;  %v406_v49 = vld [vmem:[%s2843_s30 + $0x128] sm:$0xff]  ;;  %v409_v51 = vld [vmem:[%s2843_s30 + $0x140] sm:$0xff]  ;;  %v408_v52 = vld [vmem:[%s2843_s30 + $0x138] sm:$0xff] }
  0x7c   : > { %2242 = vmatprep.subr.bf16.mxu1 %v2241_v9  ;;  %v412_v53 = vld [vmem:[%s2843_s30 + $0x158] sm:$0xff]  ;;  %v411_v54 = vld [vmem:[%s2843_s30 + $0x150] sm:$0xff]  ;;  %v414_v56 = vld [vmem:[%s2843_s30 + $0x168] sm:$0xff] }
  0x7d   : > { %2212 = vmatpush3.bf16.msra.mxu0 %v2211_v10  ;;  %v415_v55 = vld [vmem:[%s2843_s30 + $0x170] sm:$0xff]  ;;  %v890_v57 = vld [vmem:[%s3328_s3] sm:$0xff]  ;;  %v891_v58 = vld [vmem:[%s3328_s3 + $0x8] sm:$0xff] }
  0x7e   : > { %v2245_v59 = vpack.c.bf16 %v891_v58, %v890_v57  ;;  %v892_v60 = vld [vmem:[%s3328_s3 + $0x10] sm:$0xff]  ;;  %v893_v61 = vld [vmem:[%s3328_s3 + $0x18] sm:$0xff]  ;;  %v894_v63 = vld [vmem:[%s3328_s3 + $0x20] sm:$0xff] }
  0x7f   : > { %2244 = vmatpush3.bf16.msra.mxu1 %v2241_v9  ;;  %v2249_v62 = vpack.c.bf16 %v893_v61, %v892_v60  ;;  %v895_v0 = vld [vmem:[%s3328_s3 + $0x28] sm:$0xff]  ;;  %v896_v2 = vld [vmem:[%s3328_s3 + $0x30] sm:$0xff]  ;;  %v897_v3 = vld [vmem:[%s3328_s3 + $0x38] sm:$0xff] }
  0x80   : > { %537 = vmatmul.mubr.f32.vlgmr.msra.gmra.mrb[0].mxu0 %v369_v11  ;;  %2246 = vmatprep.subr.bf16.mxu1 %v2245_v59  ;;  %v2253_v1 = vpack.c.bf16 %v895_v0, %v894_v63  ;;  %v2257_v4 = vpack.c.bf16 %v897_v3, %v896_v2  ;;  %v898_v5 = vld [vmem:[%s3328_s3 + $0x40] sm:$0xff]  ;;  %v899_v6 = vld [vmem:[%s3328_s3 + $0x48] sm:$0xff]  ;;  %v900_v8 = vld [vmem:[%s3328_s3 + $0x50] sm:$0xff] }
  0x81   : > { %541 = vmatprep.mubr.f32.mxu0 %v373_v12  ;;  %v2261_v7 = vpack.c.bf16 %v899_v6, %v898_v5  ;;  %v901_v9 = vld [vmem:[%s3328_s3 + $0x58] sm:$0xff]  ;;  %v902_v11 = vld [vmem:[%s3328_s3 + $0x60] sm:$0xff]  ;;  %v903_v12 = vld [vmem:[%s3328_s3 + $0x68] sm:$0xff] }
  0x82   : > { %2011 = vmatmul.mubr.f32.vlgmr.msra.gmra.mrb[0].mxu1 %v374_v13  ;;  %v2265_v10 = vpack.c.bf16 %v901_v9, %v900_v8  ;;  %v2269_v13 = vpack.c.bf16 %v903_v12, %v902_v11 }
  0x83   : > { %2013 = vmatprep.mubr.f32.mxu1 %v377_v14  ;;  %2248 = vmatpush3.bf16.msra.mxu1 %v2245_v59  ;;  %v904_v14 = vld [vmem:[%s3328_s3 + $0x70] sm:$0xff] }
  0x84   : > { %542 = vmatmul.mubr.f32.gmra.mrb[2].mxu0 %v372_v15  ;;  %2250 = vmatprep.subr.bf16.mxu1 %v2249_v62  ;;  %v905_v15 = vld [vmem:[%s3328_s3 + $0x78] sm:$0xff] }
  0x85   : > { %546 = vmatprep.mubr.f32.mxu0 %v376_v16  ;;  %v2273_v16 = vpack.c.bf16 %v905_v15, %v904_v14 }
  0x86   : > { %2014 = vmatmul.mubr.f32.gmra.mrb[2].mxu1 %v380_v17  ;;  %v1186_v17 = vld [vmem:[%s3330_s5] sm:$0xff] }
  0x87   : > { %2016 = vmatprep.mubr.f32.mxu1 %v383_v18  ;;  %2252 = vmatpush3.bf16.msra.mxu1 %v2249_v62  ;;  %v1187_v18 = vld [vmem:[%s3330_s5 + $0x8] sm:$0xff] }
  0x88   : > { %547 = vmatmul.mubr.f32.gmra.mrb[4].mxu0 %v375_v19  ;;  %2254 = vmatprep.subr.bf16.mxu1 %v2253_v1  ;;  %v1188_v19 = vld [vmem:[%s3330_s5 + $0x10] sm:$0xff] }
  0x89   : > { %551 = vmatprep.mubr.f32.mxu0 %v379_v20  ;;  %v2277_v20 = vpack.c.bf16 %v1187_v18, %v1186_v17 }
  0x8a   : > { %2017 = vmatmul.mubr.f32.gmra.mrb[4].mxu1 %v386_v21  ;;  %v1189_v21 = vld [vmem:[%s3330_s5 + $0x18] sm:$0xff] }
  0x8b   : > { %2019 = vmatprep.mubr.f32.mxu1 %v389_v22  ;;  %2256 = vmatpush3.bf16.msra.mxu1 %v2253_v1  ;;  %v2281_v22 = vpack.c.bf16 %v1189_v21, %v1188_v19 }
  0x8c   : > { %552 = vmatmul.mubr.f32.gmra.mrb[6].mxu0 %v378_v23  ;;  %2258 = vmatprep.subr.bf16.mxu1 %v2257_v4  ;;  %v1190_v23 = vld [vmem:[%s3330_s5 + $0x20] sm:$0xff] }
  0x8d   : > { %556 = vmatprep.mubr.f32.mxu0 %v382_v24  ;;  %v1191_v24 = vld [vmem:[%s3330_s5 + $0x28] sm:$0xff]  ;;  %2278 = vmatprep.subr.bf16.mxu0 %v2277_v20 }
  0x8e   : > { %2020 = vmatmul.mubr.f32.gmra.mrb[6].mxu1 %v392_v25  ;;  %2280 = vmatpush3.bf16.msra.mxu0 %v2277_v20  ;;  %v2285_v25 = vpack.c.bf16 %v1191_v24, %v1190_v23 }
  0x8f   : > { %2022 = vmatprep.mubr.f32.mxu1 %v395_v26  ;;  %2260 = vmatpush3.bf16.msra.mxu1 %v2257_v4  ;;  %v1192_v26 = vld [vmem:[%s3330_s5 + $0x30] sm:$0xff] }
  0x90   : > { %557 = vmatmul.mubr.f32.gmra.mrb[8].mxu0 %v381_v27  ;;  %2262 = vmatprep.subr.bf16.mxu1 %v2261_v7  ;;  %v1193_v27 = vld [vmem:[%s3330_s5 + $0x38] sm:$0xff] }
  0x91   : > { %561 = vmatprep.mubr.f32.mxu0 %v385_v28  ;;  %2282 = vmatprep.subr.bf16.mxu0 %v2281_v22  ;;  %v2289_v28 = vpack.c.bf16 %v1193_v27, %v1192_v26 }
  0x92   : > { %2023 = vmatmul.mubr.f32.gmra.mrb[8].mxu1 %v398_v29  ;;  %2284 = vmatpush3.bf16.msra.mxu0 %v2281_v22  ;;  %v1194_v29 = vld [vmem:[%s3330_s5 + $0x40] sm:$0xff] }
  0x93   : > { %2025 = vmatprep.mubr.f32.mxu1 %v401_v30  ;;  %2264 = vmatpush3.bf16.msra.mxu1 %v2261_v7  ;;  %v1195_v30 = vld [vmem:[%s3330_s5 + $0x48] sm:$0xff] }
  0x94   : > { %562 = vmatmul.mubr.f32.gmra.mrb[10].mxu0 %v384_v31  ;;  %2266 = vmatprep.subr.bf16.mxu1 %v2265_v10  ;;  %v2293_v31 = vpack.c.bf16 %v1195_v30, %v1194_v29 }
  0x95   : > { %566 = vmatprep.mubr.f32.mxu0 %v388_v32  ;;  %2286 = vmatprep.subr.bf16.mxu0 %v2285_v25 }
  0x96   : > { %2026 = vmatmul.mubr.f32.gmra.mrb[10].mxu1 %v404_v33  ;;  %2288 = vmatpush3.bf16.msra.mxu0 %v2285_v25 }
  0x97   : > { %2028 = vmatprep.mubr.f32.mxu1 %v407_v34  ;;  %2268 = vmatpush3.bf16.msra.mxu1 %v2265_v10  ;;  %v2982_v34 = vld [vmem:[%s3327_s2] ss:$0 sm:$0xff] }
  0x98   : > { %567 = vmatmul.mubr.f32.gmra.mrb[12].mxu0 %v387_v35  ;;  %2270 = vmatprep.subr.bf16.mxu1 %v2269_v13 }
  0x99   : > { %571 = vmatprep.mubr.f32.mxu0 %v391_v36  ;;  %2290 = vmatprep.subr.bf16.mxu0 %v2289_v28 }
  0x9a   : > { %2029 = vmatmul.mubr.f32.gmra.mrb[12].mxu1 %v410_v37  ;;  %2292 = vmatpush3.bf16.msra.mxu0 %v2289_v28 }
  0x9b   : > { %2031 = vmatprep.mubr.f32.mxu1 %v413_v38  ;;  %2272 = vmatpush3.bf16.msra.mxu1 %v2269_v13 }
  0x9c   : > { %572 = vmatmul.mubr.f32.gmra.mrb[14].mxu0 %v390_v39  ;;  %2274 = vmatprep.subr.bf16.mxu1 %v2273_v16 }
  0x9d   : > { %576 = vmatprep.mubr.f32.mxu0 %v394_v40  ;;  %2294 = vmatprep.subr.bf16.mxu0 %v2293_v31 }
  0x9e   : > { %2032 = vmatmul.mubr.f32.gmra.mrb[14].mxu1 %v416_v41  ;;  %2296 = vmatpush3.bf16.msra.mxu0 %v2293_v31 }
  0x9f   : > { %2276 = vmatpush3.bf16.msra.mxu1 %v2273_v16 }
  0xa0   : > { %577 = vmatmul.mubr.f32.gmra.mrb[16].mxu0 %v393_v42 }
  0xa1   : > { %581 = vmatprep.mubr.f32.mxu0 %v397_v43 }
  0xa4   : > { %582 = vmatmul.mubr.f32.gmra.mrb[18].mxu0 %v396_v44 }
  0xa5   : > { %586 = vmatprep.mubr.f32.mxu0 %v400_v45 }
  0xa8   : > { %587 = vmatmul.mubr.f32.gmra.mrb[20].mxu0 %v399_v46 }
  0xa9   : > { %591 = vmatprep.mubr.f32.mxu0 %v403_v47 }
  0xac   : > { %592 = vmatmul.mubr.f32.gmra.mrb[22].mxu0 %v402_v48 }
  0xad   : > { %596 = vmatprep.mubr.f32.mxu0 %v406_v49 }
  0xb0   : > { %597 = vmatmul.mubr.f32.gmra.mrb[24].mxu0 %v405_v50 }
  0xb1   : > { %601 = vmatprep.mubr.f32.mxu0 %v409_v51 }
  0xb4   : > { %602 = vmatmul.mubr.f32.gmra.mrb[26].mxu0 %v408_v52 }
  0xb5   : > { %606 = vmatprep.mubr.f32.mxu0 %v412_v53 }
  0xb8   : > { %607 = vmatmul.mubr.f32.gmra.mrb[28].mxu0 %v411_v54 }
  0xb9   : > { %611 = vmatprep.mubr.f32.mxu0 %v415_v55 }
  0xbc   : > { %612 = vmatmul.mubr.f32.gmra.mrb[30].mxu0 %v414_v56 }
 0x153   : > { %v1817_v32 = vpop.f32.mrb[0].mxu0 }
 0x154   : > { %v1818_v33 = vpop.f32.mrb[1].mxu0 }
 0x155   : > { %v1819_v35 = vadd.f32 %v1818_v33, %v1817_v32  ;;  %v2012_v36 = vpop.f32.mrb[0].mxu1 }
 0x156   : > { %v683_v37 = vpop.f32.mrb[1].mxu1 }
 0x157   : > { %v1820_v38 = vpop.f32.mrb[2].mxu0  ;;  %v539_v39 = vadd.f32 %v1819_v35, %v2982_v34 }
 0x158   : > { %v1821_v40 = vpop.f32.mrb[3].mxu0 }
 0x159   : > { %v1822_v41 = vadd.f32 %v1821_v40, %v1820_v38  ;;  %v2985_v42 = vadd.f32 %v683_v37, %v539_v39  ;;  %v2015_v43 = vpop.f32.mrb[2].mxu1 }
 0x15a   : > { %v693_v44 = vpop.f32.mrb[3].mxu1 }
 0x15b   : > { %v544_v45 = vadd.f32 %v1822_v41, %v2982_v34  ;;  %v778_v46 = vmin.f32 %v2985_v42, 0.0  ;;  %v1823_v47 = vpop.f32.mrb[4].mxu0  ;;  %vm762_vm0 = vcmp.gt.f32.partialorder %v2985_v42, 0.0 }
 0x15c   : > { %v1824_v48 = vpop.f32.mrb[5].mxu0 }
 0x15d   : > { %v2989_v49 = vadd.f32 %v2012_v36, %v544_v45  ;;  %v794_v50 = vmul.f32 10.0, %v778_v46  ;;  %v1825_v51 = vadd.f32 %v1824_v48, %v1823_v47  ;;  %v2018_v52 = vpop.f32.mrb[4].mxu1 }
 0x15e   : > { %v703_v53 = vpop.f32.mrb[5].mxu1 }
 0x15f   : > { %v779_v54 = vmin.f32 %v2989_v49, 0.0  ;;  %v810_v55 = vmul.f32 1.442695, %v794_v50  ;;  %v1826_v56 = vpop.f32.mrb[6].mxu0  ;;  %v549_v57 = vadd.f32 %v1825_v51, %v2982_v34  ;;  %vm763_vm1 = vcmp.gt.f32.partialorder %v2989_v49, 0.0 }
 0x160   : > { %v1827_v58 = vpop.f32.mrb[7].mxu0 }
 0x161   : > { %v795_v59 = vmul.f32 10.0, %v779_v54  ;;  %2410 = vpow2.f32 %v810_v55  ;;  %v1828_v60 = vadd.f32 %v1827_v58, %v1826_v56  ;;  %v2993_v61 = vadd.f32 %v693_v44, %v549_v57  ;;  %v2995_v62 = vpop.f32.mrb[6].mxu1 }
 0x162   : > { %v713_v63 = vpop.f32.mrb[7].mxu1 }
 0x163   : > { %v812_v0 = vmul.f32 1.442695, %v795_v59  ;;  %v554_v1 = vadd.f32 %v1828_v60, %v2982_v34  ;;  %v780_v2 = vmin.f32 %v2993_v61, 0.0  ;;  %v1829_v3 = vpop.f32.mrb[8].mxu0  ;;  %vm764_vm2 = vcmp.gt.f32.partialorder %v2993_v61, 0.0 }
 0x164   : > { %v1830_v4 = vpop.f32.mrb[9].mxu0 }
 0x165   : > { %2412 = vpow2.f32 %v812_v0  ;;  %v2999_v5 = vadd.f32 %v2015_v43, %v554_v1  ;;  %v796_v6 = vmul.f32 10.0, %v780_v2  ;;  %v1831_v7 = vadd.f32 %v1830_v4, %v1829_v3  ;;  %v3001_v8 = vpop.f32.mrb[8].mxu1 }
 0x166   : > { %v3003_v9 = vpop.f32.mrb[9].mxu1 }
 0x167   : > { %v781_v10 = vmin.f32 %v2999_v5, 0.0  ;;  %v814_v11 = vmul.f32 1.442695, %v796_v6  ;;  %v1832_v12 = vpop.f32.mrb[10].mxu0  ;;  %v559_v13 = vadd.f32 %v1831_v7, %v2982_v34  ;;  %vm765_vm3 = vcmp.gt.f32.partialorder %v2999_v5, 0.0 }
 0x168   : > { %v1833_v14 = vpop.f32.mrb[11].mxu0 }
 0x169   : > { %v797_v15 = vmul.f32 10.0, %v781_v10  ;;  %2414 = vpow2.f32 %v814_v11  ;;  %v1834_v16 = vadd.f32 %v1833_v14, %v1832_v12  ;;  %v3007_v17 = vadd.f32 %v703_v53, %v559_v13  ;;  %v3009_v18 = vpop.f32.mrb[10].mxu1 }
 0x16a   : > { %v3011_v19 = vpop.f32.mrb[11].mxu1 }
 0x16b   : > { %v2411_v20 = vpop.eup %2410  ;;  %v564_v21 = vadd.f32 %v1834_v16, %v2982_v34  ;;  %v782_v22 = vmin.f32 %v3007_v17, 0.0  ;;  %v1835_v23 = vpop.f32.mrb[12].mxu0  ;;  %v816_v24 = vmul.f32 1.442695, %v797_v15  ;;  %vm766_vm4 = vcmp.gt.f32.partialorder %v3007_v17, 0.0 }
 0x16c   : > { %v1836_v25 = vpop.f32.mrb[13].mxu0  ;;  %v1715_v26 = vadd.f32 -1.0, %v2411_v20 }
 0x16d   : > { %v3015_v27 = vadd.f32 %v2018_v52, %v564_v21  ;;  %v798_v28 = vmul.f32 10.0, %v782_v22  ;;  %v1837_v29 = vadd.f32 %v1836_v25, %v1835_v23  ;;  %2416 = vpow2.f32 %v816_v24  ;;  %v3017_v30 = vpop.f32.mrb[12].mxu1 }
 0x16e   : > { %v858_v31 = vmul.f32 0.1, %v1715_v26  ;;  %v3019_v32 = vpop.f32.mrb[13].mxu1 }
 0x16f   : > { %v2413_v33 = vpop.eup %2412  ;;  %v783_v35 = vmin.f32 %v3015_v27, 0.0  ;;  %v818_v36 = vmul.f32 1.442695, %v798_v28  ;;  %v1838_v37 = vpop.f32.mrb[14].mxu0  ;;  %v569_v38 = vadd.f32 %v1837_v29, %v2982_v34  ;;  %vm767_vm5 = vcmp.gt.f32.partialorder %v3015_v27, 0.0 }
 0x170   : > { %v1839_v39 = vpop.f32.mrb[15].mxu0  ;;  %v874_v40 = vsel %vm762_vm0, %v2985_v42, %v858_v31  ;;  %v1716_v41 = vadd.f32 -1.0, %v2413_v33 }
 0x171   : > { %v799_v43 = vmul.f32 10.0, %v783_v35  ;;  %2418 = vpow2.f32 %v818_v36  ;;  %v1840_v44 = vadd.f32 %v1839_v39, %v1838_v37  ;;  %v3025_v45 = vadd.f32 %v713_v63, %v569_v38  ;;  %2066 = vmatprep.mubr.f32.mxu1 %v874_v40  ;;  %v3027_v46 = vpop.f32.mrb[14].mxu1 }
 0x172   : > { %v859_v47 = vmul.f32 0.1, %v1716_v41  ;;  %v3029_v48 = vpop.f32.mrb[15].mxu1 }
 0x173   : > { %v2415_v50 = vpop.eup %2414  ;;  %v574_v51 = vadd.f32 %v1840_v44, %v2982_v34  ;;  %v784_v52 = vmin.f32 %v3025_v45, 0.0  ;;  %v1841_v53 = vpop.f32.mrb[16].mxu0  ;;  %v820_v42 = vmul.f32 1.442695, %v799_v43  ;;  %vm768_vm6 = vcmp.gt.f32.partialorder %v3025_v45, 0.0 }
 0x174   : > { %v1842_v54 = vpop.f32.mrb[17].mxu0  ;;  %v875_v55 = vsel %vm763_vm1, %v2989_v49, %v859_v47  ;;  %v1717_v56 = vadd.f32 -1.0, %v2415_v50 }
 0x175   : > { %v3036_v57 = vadd.f32 %v2995_v62, %v574_v51  ;;  %v800_v58 = vmul.f32 10.0, %v784_v52  ;;  %v1843_v59 = vadd.f32 %v1842_v54, %v1841_v53  ;;  %2067 = vmatmul.mubr.f32.vlgmr.msra.gmra.mrb[16].mxu1 %v875_v55  ;;  %2420 = vpow2.f32 %v820_v42 }
 0x176   : > { %v860_v60 = vmul.f32 0.1, %v1717_v56 }
 0x177   : > { %v2417_v63 = vpop.eup %2416  ;;  %v785_v0 = vmin.f32 %v3036_v57, 0.0  ;;  %v822_v1 = vmul.f32 1.442695, %v800_v58  ;;  %v1844_v2 = vpop.f32.mrb[18].mxu0  ;;  %v579_v3 = vadd.f32 %v1843_v59, %v2982_v34  ;;  %vm769_vm7 = vcmp.gt.f32.partialorder %v3036_v57, 0.0 }
 0x178   : > { %v1845_v4 = vpop.f32.mrb[19].mxu0  ;;  %v876_v49 = vsel %vm764_vm2, %v2993_v61, %v860_v60  ;;  %v1718_v6 = vadd.f32 -1.0, %v2417_v63 }
 0x179   : > { %v801_v62 = vmul.f32 10.0, %v785_v0  ;;  %2422 = vpow2.f32 %v822_v1  ;;  %v1846_v7 = vadd.f32 %v1845_v4, %v1844_v2  ;;  %v3043_v10 = vadd.f32 %v3003_v9, %v579_v3  ;;  %2069 = vmatprep.mubr.f32.mxu1 %v876_v49 }
 0x17a   : > { %v861_v11 = vmul.f32 0.1, %v1718_v6 }
 0x17b   : > { %v2419_v12 = vpop.eup %2418  ;;  %v584_v13 = vadd.f32 %v1846_v7, %v2982_v34  ;;  %v786_v14 = vmin.f32 %v3043_v10, 0.0  ;;  %v1847_v15 = vpop.f32.mrb[20].mxu0  ;;  %v824_v16 = vmul.f32 1.442695, %v801_v62  ;;  %vm770_vm8 = vcmp.gt.f32.partialorder %v3043_v10, 0.0 }
 0x17c   : > { %v1848_v20 = vpop.f32.mrb[21].mxu0  ;;  %v877_v61 = vsel %vm765_vm3, %v2999_v5, %v861_v11  ;;  %v1719_v21 = vadd.f32 -1.0, %v2419_v12 }
 0x17d   : > { %v3050_v22 = vadd.f32 %v3001_v8, %v584_v13  ;;  %v802_v9 = vmul.f32 10.0, %v786_v14  ;;  %v1849_v23 = vadd.f32 %v1848_v20, %v1847_v15  ;;  %2070 = vmatmul.mubr.f32.gmra.mrb[18].mxu1 %v877_v61  ;;  %2424 = vpow2.f32 %v824_v16 }
 0x17e   : > { %v862_v24 = vmul.f32 0.1, %v1719_v21 }
 0x17f   : > { %v2421_v25 = vpop.eup %2420  ;;  %v787_v26 = vmin.f32 %v3050_v22, 0.0  ;;  %v826_v28 = vmul.f32 1.442695, %v802_v9  ;;  %v1850_v29 = vpop.f32.mrb[22].mxu0  ;;  %v589_v31 = vadd.f32 %v1849_v23, %v2982_v34  ;;  %vm771_vm9 = vcmp.gt.f32.partialorder %v3050_v22, 0.0 }
 0x180   : > { %v1851_v33 = vpop.f32.mrb[23].mxu0  ;;  %v878_v5 = vsel %vm766_vm4, %v3007_v17, %v862_v24  ;;  %v1720_v35 = vadd.f32 -1.0, %v2421_v25 }
 0x181   : > { %v803_v8 = vmul.f32 10.0, %v787_v26  ;;  %2426 = vpow2.f32 %v826_v28  ;;  %v1852_v36 = vadd.f32 %v1851_v33, %v1850_v29  ;;  %v3057_v37 = vadd.f32 %v3011_v19, %v589_v31  ;;  %2072 = vmatprep.mubr.f32.mxu1 %v878_v5 }
 0x182   : > { %v863_v38 = vmul.f32 0.1, %v1720_v35 }
 0x183   : > { %v2423_v39 = vpop.eup %2422  ;;  %v594_v40 = vadd.f32 %v1852_v36, %v2982_v34  ;;  %v788_v41 = vmin.f32 %v3057_v37, 0.0  ;;  %v1853_v43 = vpop.f32.mrb[24].mxu0  ;;  %v828_v44 = vmul.f32 1.442695, %v803_v8  ;;  %vm772_vm10 = vcmp.gt.f32.partialorder %v3057_v37, 0.0 }
 0x184   : > { %v1854_v47 = vpop.f32.mrb[25].mxu0  ;;  %v879_v17 = vsel %vm767_vm5, %v3015_v27, %v863_v38  ;;  %v1721_v50 = vadd.f32 -1.0, %v2423_v39 }
 0x185   : > { %v3064_v51 = vadd.f32 %v3009_v18, %v594_v40  ;;  %v804_v19 = vmul.f32 10.0, %v788_v41  ;;  %v1855_v52 = vadd.f32 %v1854_v47, %v1853_v43  ;;  %2073 = vmatmul.mubr.f32.gmra.mrb[20].mxu1 %v879_v17  ;;  %2428 = vpow2.f32 %v828_v44 }
 0x186   : > { %v864_v53 = vmul.f32 0.1, %v1721_v50 }
 0x187   : > { %v2425_v42 = vpop.eup %2424  ;;  %v789_v54 = vmin.f32 %v3064_v51, 0.0  ;;  %v830_v55 = vmul.f32 1.442695, %v804_v19  ;;  %v1856_v56 = vpop.f32.mrb[26].mxu0  ;;  %v599_v58 = vadd.f32 %v1855_v52, %v2982_v34  ;;  %vm773_vm11 = vcmp.gt.f32.partialorder %v3064_v51, 0.0 }
 0x188   : > { %v1857_v59 = vpop.f32.mrb[27].mxu0  ;;  %v880_v27 = vsel %vm768_vm6, %v3025_v45, %v864_v53  ;;  %v1722_v60 = vadd.f32 -1.0, %v2425_v42 }
 0x189   : > { %v805_v18 = vmul.f32 10.0, %v789_v54  ;;  %2430 = vpow2.f32 %v830_v55  ;;  %v1858_v63 = vadd.f32 %v1857_v59, %v1856_v56  ;;  %v3071_v0 = vadd.f32 %v3019_v32, %v599_v58  ;;  %2075 = vmatprep.mubr.f32.mxu1 %v880_v27  ;;  %v1196_v27 = vld [vmem:[%s3330_s5 + $0x50] sm:$0xff] }
 0x18a   : > { %v865_v1 = vmul.f32 0.1, %v1722_v60  ;;  %v1197_v60 = vld [vmem:[%s3330_s5 + $0x58] sm:$0xff] }
 0x18b   : > { %v2427_v2 = vpop.eup %2426  ;;  %v604_v3 = vadd.f32 %v1858_v63, %v2982_v34  ;;  %v790_v4 = vmin.f32 %v3071_v0, 0.0  ;;  %v1859_v49 = vpop.f32.mrb[28].mxu0  ;;  %v832_v6 = vmul.f32 1.442695, %v805_v18  ;;  %vm774_vm12 = vcmp.gt.f32.partialorder %v3071_v0, 0.0  ;;  %v1198_v63 = vld [vmem:[%s3330_s5 + $0x60] sm:$0xff] }
 0x18c   : > { %v1860_v62 = vpop.f32.mrb[29].mxu0  ;;  %v881_v45 = vsel %vm769_vm7, %v3036_v57, %v865_v1  ;;  %v1723_v7 = vadd.f32 -1.0, %v2427_v2  ;;  %v2297_v18 = vpack.c.bf16 %v1197_v60, %v1196_v27  ;;  %v1200_v2 = vld [vmem:[%s3330_s5 + $0x70] sm:$0xff] }
 0x18d   : > { %v749_v11 = vadd.f32 %v3017_v30, %v604_v3  ;;  %v806_v12 = vmul.f32 10.0, %v790_v4  ;;  %v1861_v32 = vadd.f32 %v1860_v62, %v1859_v49  ;;  %2076 = vmatmul.mubr.f32.gmra.mrb[22].mxu1 %v881_v45  ;;  %2432 = vpow2.f32 %v832_v6  ;;  %v1201_v3 = vld [vmem:[%s3330_s5 + $0x78] sm:$0xff]  ;;  %v3113_v49 = vld [vmem:[%s3329_s4] ss:$0 sm:$0xff] }
 0x18e   : > { %v866_v13 = vmul.f32 0.1, %v1723_v7  ;;  %2298 = vmatprep.subr.bf16.mxu0 %v2297_v18  ;;  %v2305_v4 = vpack.c.bf16 %v1201_v3, %v1200_v2 }
 0x18f   : > { %v2429_v14 = vpop.eup %2428  ;;  %v791_v15 = vmin.f32 %v749_v11, 0.0  ;;  %v834_v16 = vmul.f32 1.442695, %v806_v12  ;;  %v1862_v20 = vpop.f32.mrb[30].mxu0  ;;  %v609_v61 = vadd.f32 %v1861_v32, %v2982_v34  ;;  %vm775_vm13 = vcmp.gt.f32.partialorder %v749_v11, 0.0  ;;  %2300 = vmatpush3.bf16.msra.mxu0 %v2297_v18 }
 0x190   : > { %v1863_v21 = vpop.f32.mrb[31].mxu0  ;;  %v882_v9 = vsel %vm770_vm8, %v3043_v10, %v866_v13  ;;  %v1724_v57 = vadd.f32 -1.0, %v2429_v14 }
 0x191   : > { %v807_v23 = vmul.f32 10.0, %v791_v15  ;;  %2434 = vpow2.f32 %v834_v16  ;;  %v1864_v30 = vadd.f32 %v1863_v21, %v1862_v20  ;;  %v754_v24 = vadd.f32 %v3029_v48, %v609_v61  ;;  %2078 = vmatprep.mubr.f32.mxu1 %v882_v9 }
 0x192   : > { %v867_v25 = vmul.f32 0.1, %v1724_v57 }
 0x193   : > { %v2431_v26 = vpop.eup %2430  ;;  %v614_v28 = vadd.f32 %v1864_v30, %v2982_v34  ;;  %v792_v29 = vmin.f32 %v754_v24, 0.0  ;;  %v836_v31 = vmul.f32 1.442695, %v807_v23  ;;  %vm776_vm14 = vcmp.gt.f32.partialorder %v754_v24, 0.0 }
 0x194   : > { %v883_v33 = vsel %vm771_vm9, %v3050_v22, %v867_v25  ;;  %v1725_v5 = vadd.f32 -1.0, %v2431_v26 }
 0x195   : > { %v759_v10 = vadd.f32 %v3027_v46, %v614_v28  ;;  %v808_v35 = vmul.f32 10.0, %v792_v29  ;;  %2079 = vmatmul.mubr.f32.gmra.mrb[24].mxu1 %v883_v33  ;;  %2436 = vpow2.f32 %v836_v31 }
 0x196   : > { %v868_v8 = vmul.f32 0.1, %v1725_v5 }
 0x197   : > { %v2433_v36 = vpop.eup %2432  ;;  %v793_v48 = vmin.f32 %v759_v10, 0.0  ;;  %v838_v38 = vmul.f32 1.442695, %v808_v35  ;;  %vm777_vm15 = vcmp.gt.f32.partialorder %v759_v10, 0.0 }
 0x198   : > { %v884_v34 = vsel %vm772_vm10, %v3057_v37, %v868_v8  ;;  %v1726_v39 = vadd.f32 -1.0, %v2433_v36 }
 0x199   : > { %v809_v40 = vmul.f32 10.0, %v793_v48  ;;  %2438 = vpow2.f32 %v838_v38  ;;  %2081 = vmatprep.mubr.f32.mxu1 %v884_v34 }
 0x19a   : > { %v869_v41 = vmul.f32 0.1, %v1726_v39 }
 0x19b   : > { %v2435_v22 = vpop.eup %2434  ;;  %v840_v46 = vmul.f32 1.442695, %v809_v40 }
 0x19c   : > { %v885_v43 = vsel %vm773_vm11, %v3064_v51, %v869_v41  ;;  %v1727_v44 = vadd.f32 -1.0, %v2435_v22 }
 0x19d   : > { %2082 = vmatmul.mubr.f32.gmra.mrb[26].mxu1 %v885_v43  ;;  %2440 = vpow2.f32 %v840_v46 }
 0x19e   : > { %v870_v47 = vmul.f32 0.1, %v1727_v44 }
 0x19f   : > { %v2437_v17 = vpop.eup %2436 }
 0x1a0   : > { %v886_v37 = vsel %vm774_vm12, %v3071_v0, %v870_v47  ;;  %v1728_v50 = vadd.f32 -1.0, %v2437_v17  ;;  %v1199_v0 = vld [vmem:[%s3330_s5 + $0x68] sm:$0xff] }
 0x1a1   : > { %2084 = vmatprep.mubr.f32.mxu1 %v886_v37  ;;  %v2301_v1 = vpack.c.bf16 %v1199_v0, %v1198_v63 }
 0x1a2   : > { %v871_v19 = vmul.f32 0.1, %v1728_v50 }
 0x1a3   : > { %v2439_v52 = vpop.eup %2438  ;;  %2302 = vmatprep.subr.bf16.mxu0 %v2301_v1 }
 0x1a4   : > { %v887_v53 = vsel %vm775_vm13, %v749_v11, %v871_v19  ;;  %v1729_v42 = vadd.f32 -1.0, %v2439_v52  ;;  %2304 = vmatpush3.bf16.msra.mxu0 %v2301_v1 }
 0x1a5   : > { %2085 = vmatmul.mubr.f32.gmra.mrb[28].mxu1 %v887_v53  ;;  %2306 = vmatprep.subr.bf16.mxu0 %v2305_v4 }
 0x1a6   : > { %v872_v54 = vmul.f32 0.1, %v1729_v42 }
 0x1a7   : > { %v2441_v55 = vpop.eup %2440 }
 0x1a8   : > { %v888_v51 = vsel %vm776_vm14, %v754_v24, %v872_v54  ;;  %v1730_v56 = vadd.f32 -1.0, %v2441_v55  ;;  %2308 = vmatpush3.bf16.msra.mxu0 %v2305_v4 }
 0x1a9   : > { %2087 = vmatprep.mubr.f32.mxu1 %v888_v51 }
 0x1aa   : > { %v873_v58 = vmul.f32 0.1, %v1730_v56 }
 0x1ac   : > { %v889_v59 = vsel %vm777_vm15, %v759_v10, %v873_v58 }
 0x1ad   : > { %2088 = vmatmul.mubr.f32.gmra.mrb[30].mxu1 %v889_v59 }
 0x248   : > { %v2068_v6 = vpop.f32.mrb[16].mxu1 }
 0x249   : > { %v985_v62 = vadd.f32 %v2068_v6, %v3113_v49  ;;  %v979_v45 = vpop.f32.mrb[17].mxu1 }
 0x24a   : > { %v980_v7 = vadd.f32 %v3113_v49, %v979_v45 }
 0x24b   : > { %v1075_v11 = vmin.f32 %v985_v62, 0.0  ;;  %vm1059_vm1 = vcmp.gt.f32.partialorder %v985_v62, 0.0 }
 0x24c   : > { %v1074_v12 = vmin.f32 %v980_v7, 0.0  ;;  %vm1058_vm0 = vcmp.gt.f32.partialorder %v980_v7, 0.0 }
 0x24d   : > { %v1091_v32 = vmul.f32 10.0, %v1075_v11 }
 0x24e   : > { %v1090_v13 = vmul.f32 10.0, %v1074_v12 }
 0x24f   : > { %v1108_v14 = vmul.f32 1.442695, %v1091_v32 }
 0x250   : > { %v1106_v15 = vmul.f32 1.442695, %v1090_v13  ;;  %v2071_v16 = vpop.f32.mrb[18].mxu1 }
 0x251   : > { %2442 = vpow2.f32 %v1108_v14  ;;  %v3118_v20 = vadd.f32 %v2071_v16, %v3113_v49  ;;  %v989_v61 = vpop.f32.mrb[19].mxu1 }
 0x252   : > { %2444 = vpow2.f32 %v1106_v15  ;;  %v990_v21 = vadd.f32 %v3113_v49, %v989_v61 }
 0x253   : > { %v1077_v9 = vmin.f32 %v3118_v20, 0.0  ;;  %vm1061_vm3 = vcmp.gt.f32.partialorder %v3118_v20, 0.0 }
 0x254   : > { %v1076_v57 = vmin.f32 %v990_v21, 0.0  ;;  %vm1060_vm2 = vcmp.gt.f32.partialorder %v990_v21, 0.0 }
 0x255   : > { %v1093_v23 = vmul.f32 10.0, %v1077_v9 }
 0x256   : > { %v1092_v30 = vmul.f32 10.0, %v1076_v57 }
 0x257   : > { %v1112_v24 = vmul.f32 1.442695, %v1093_v23 }
 0x258   : > { %v1110_v25 = vmul.f32 1.442695, %v1092_v30  ;;  %v2074_v26 = vpop.f32.mrb[20].mxu1 }
 0x259   : > { %2446 = vpow2.f32 %v1112_v24  ;;  %v3123_v28 = vadd.f32 %v2074_v26, %v3113_v49  ;;  %v999_v29 = vpop.f32.mrb[21].mxu1 }
 0x25a   : > { %2448 = vpow2.f32 %v1110_v25  ;;  %v3126_v31 = vadd.f32 %v3113_v49, %v999_v29 }
 0x25b   : > { %v2443_v33 = vpop.eup %2442  ;;  %v1079_v5 = vmin.f32 %v3123_v28, 0.0  ;;  %vm1063_vm5 = vcmp.gt.f32.partialorder %v3123_v28, 0.0 }
 0x25c   : > { %v2445_v10 = vpop.eup %2444  ;;  %v1733_v35 = vadd.f32 -1.0, %v2443_v33  ;;  %v1078_v8 = vmin.f32 %v3126_v31, 0.0  ;;  %vm1062_vm4 = vcmp.gt.f32.partialorder %v3126_v31, 0.0 }
 0x25d   : > { %v1095_v36 = vmul.f32 10.0, %v1079_v5  ;;  %v1732_v48 = vadd.f32 -1.0, %v2445_v10 }
 0x25e   : > { %v1155_v38 = vmul.f32 0.1, %v1733_v35  ;;  %v1094_v34 = vmul.f32 10.0, %v1078_v8 }
 0x25f   : > { %v1116_v39 = vmul.f32 1.442695, %v1095_v36  ;;  %v1154_v40 = vmul.f32 0.1, %v1732_v48 }
 0x260   : > { %v1114_v41 = vmul.f32 1.442695, %v1094_v34  ;;  %v2077_v22 = vpop.f32.mrb[22].mxu1  ;;  %v1171_v47 = vsel %vm1059_vm1, %v985_v62, %v1155_v38  ;;  %vm1493_vm1 = vcmask 523264  }
 0x261   : > { %2450 = vpow2.f32 %v1116_v39  ;;  %v3131_v46 = vadd.f32 %v2077_v22, %v3113_v49  ;;  %v1009_v43 = vpop.f32.mrb[23].mxu1  ;;  %v1170_v44 = vsel %vm1058_vm0, %v980_v7, %v1154_v40  ;;  %vm2643_vm0 = vmmov 0  }
 0x262   : > { %2452 = vpow2.f32 %v1114_v41  ;;  %v3134_v17 = vadd.f32 %v3113_v49, %v1009_v43  ;;  %2122 = vmatprep.mubr.f32.mxu0 %v1170_v44 }
 0x263   : > { %v2447_v37 = vpop.eup %2446  ;;  %v1081_v50 = vmin.f32 %v3131_v46, 0.0  ;;  %2123 = vmatmul.mubr.f32.vlgmr.msra.gmra.mrb[32].mxu0 %v1171_v47  ;;  %vm1065_vm7 = vcmp.gt.f32.partialorder %v3131_v46, 0.0 }
 0x264   : > { %v2449_v19 = vpop.eup %2448  ;;  %v1080_v52 = vmin.f32 %v3134_v17, 0.0  ;;  %v1735_v53 = vadd.f32 -1.0, %v2447_v37  ;;  %vm1064_vm6 = vcmp.gt.f32.partialorder %v3134_v17, 0.0 }
 0x265   : > { %v1097_v42 = vmul.f32 10.0, %v1081_v50  ;;  %v1734_v54 = vadd.f32 -1.0, %v2449_v19 }
 0x266   : > { %v1096_v55 = vmul.f32 10.0, %v1080_v52  ;;  %v1157_v51 = vmul.f32 0.1, %v1735_v53 }
 0x267   : > { %v1120_v56 = vmul.f32 1.442695, %v1097_v42  ;;  %v1156_v58 = vmul.f32 0.1, %v1734_v54 }
 0x268   : > { %v1118_v59 = vmul.f32 1.442695, %v1096_v55  ;;  %v2080_v27 = vpop.f32.mrb[24].mxu1  ;;  %v1173_v1 = vsel %vm1061_vm3, %v3118_v20, %v1157_v51 }
 0x269   : > { %2454 = vpow2.f32 %v1120_v56  ;;  %v3139_v60 = vadd.f32 %v2080_v27, %v3113_v49  ;;  %v1019_v18 = vpop.f32.mrb[25].mxu1  ;;  %v1172_v63 = vsel %vm1060_vm2, %v990_v21, %v1156_v58 }
 0x26a   : > { %2456 = vpow2.f32 %v1118_v59  ;;  %v3143_v0 = vadd.f32 %v3113_v49, %v1019_v18  ;;  %2125 = vmatprep.mubr.f32.mxu0 %v1172_v63 }
 0x26b   : > { %v2451_v2 = vpop.eup %2450  ;;  %v1083_v3 = vmin.f32 %v3139_v60, 0.0  ;;  %2126 = vmatmul.mubr.f32.gmra.mrb[34].mxu0 %v1173_v1  ;;  %vm1067_vm9 = vcmp.gt.f32.partialorder %v3139_v60, 0.0 }
 0x26c   : > { %v2453_v4 = vpop.eup %2452  ;;  %v1082_v6 = vmin.f32 %v3143_v0, 0.0  ;;  %v1737_v62 = vadd.f32 -1.0, %v2451_v2  ;;  %vm1066_vm8 = vcmp.gt.f32.partialorder %v3143_v0, 0.0 }
 0x26d   : > { %v1099_v45 = vmul.f32 10.0, %v1083_v3  ;;  %v1736_v7 = vadd.f32 -1.0, %v2453_v4 }
 0x26e   : > { %v1098_v11 = vmul.f32 10.0, %v1082_v6  ;;  %v1159_v12 = vmul.f32 0.1, %v1737_v62 }
 0x26f   : > { %v1124_v32 = vmul.f32 1.442695, %v1099_v45  ;;  %v1158_v13 = vmul.f32 0.1, %v1736_v7 }
 0x270   : > { %v1122_v14 = vmul.f32 1.442695, %v1098_v11  ;;  %v2083_v15 = vpop.f32.mrb[26].mxu1  ;;  %v1175_v9 = vsel %vm1063_vm5, %v3123_v28, %v1159_v12 }
 0x271   : > { %2458 = vpow2.f32 %v1124_v32  ;;  %v3150_v16 = vadd.f32 %v2083_v15, %v3113_v49  ;;  %v1029_v20 = vpop.f32.mrb[27].mxu1  ;;  %v1174_v61 = vsel %vm1062_vm4, %v3126_v31, %v1158_v13  ;;  %vm3204_vm4 = vmpackc.low %vm1493_vm1, %vm1493_vm1 }
 0x272   : > { %2460 = vpow2.f32 %v1122_v14  ;;  %v3155_v21 = vadd.f32 %v3113_v49, %v1029_v20  ;;  %2128 = vmatprep.mubr.f32.mxu0 %v1174_v61 }
 0x273   : > { %v2455_v57 = vpop.eup %2454  ;;  %v1085_v23 = vmin.f32 %v3150_v16, 0.0  ;;  %2129 = vmatmul.mubr.f32.gmra.mrb[36].mxu0 %v1175_v9  ;;  %vm1069_vm11 = vcmp.gt.f32.partialorder %v3150_v16, 0.0 }
 0x274   : > { %v2457_v30 = vpop.eup %2456  ;;  %v1084_v24 = vmin.f32 %v3155_v21, 0.0  ;;  %v1739_v25 = vadd.f32 -1.0, %v2455_v57  ;;  %vm1068_vm10 = vcmp.gt.f32.partialorder %v3155_v21, 0.0 }
 0x275   : > { %v1101_v26 = vmul.f32 10.0, %v1085_v23  ;;  %v1738_v29 = vadd.f32 -1.0, %v2457_v30  ;;  %v2642_v30 = vmov 0.0|0.0  }
 0x276   : > { %v1100_v31 = vmul.f32 10.0, %v1084_v24  ;;  %v1161_v33 = vmul.f32 0.1, %v1739_v25  ;;  %2309 = vmatprep.subr.bf16.mxu1 %v2642_v30  ;;  %v2644_v24 = vmov 0.0   ;;  %v1483_v25 = vld [vmem:[#allocation2] sm:$0x1] }
 0x277   : > { %v1128_v5 = vmul.f32 1.442695, %v1101_v26  ;;  %v1160_v10 = vmul.f32 0.1, %v1738_v29  ;;  %2178 = vmatprep.mubr.msk.f32.mxu1 %vm2643_vm0, %v2644_v24  ;;  %v2645_v26 = vmov 0  }
 0x278   : > { %v1126_v35 = vmul.f32 1.442695, %v1100_v31  ;;  %v2086_v8 = vpop.f32.mrb[28].mxu1  ;;  %v1177_v34 = vsel %vm1065_vm7, %v3131_v46, %v1161_v33  ;;  %2409 = vset.pattern.permute.xlu0 %v2645_v26  ;;  %v3185_v29 = vld [vmem:[%s3331_s6] ss:$0 sm:$0xff] }
 0x279   : > { %2462 = vpow2.f32 %v1128_v5  ;;  %v3162_v28 = vadd.f32 %v2086_v8, %v3113_v49  ;;  %v1039_v36 = vpop.f32.mrb[29].mxu1  ;;  %v1176_v48 = vsel %vm1064_vm6, %v3134_v17, %v1160_v10  ;;  %1486 = vperm.xlu0 %2409, %v1483_v25  }
 0x27a   : > { %2464 = vpow2.f32 %v1126_v35  ;;  %v1040_v38 = vadd.f32 %v3113_v49, %v1039_v36  ;;  %2131 = vmatprep.mubr.f32.mxu0 %v1176_v48 }
 0x27b   : > { %v2459_v39 = vpop.eup %2458  ;;  %v1087_v40 = vmin.f32 %v3162_v28, 0.0  ;;  %2132 = vmatmul.mubr.f32.gmra.mrb[38].mxu0 %v1177_v34  ;;  %vm1071_vm13 = vcmp.gt.f32.partialorder %v3162_v28, 0.0 }
 0x27c   : > { %v2461_v41 = vpop.eup %2460  ;;  %v1086_v22 = vmin.f32 %v1040_v38, 0.0  ;;  %v1741_v43 = vadd.f32 -1.0, %v2459_v39  ;;  %vm1070_vm12 = vcmp.gt.f32.partialorder %v1040_v38, 0.0 }
 0x27d   : > { %v1103_v44 = vmul.f32 10.0, %v1087_v40  ;;  %v1740_v47 = vadd.f32 -1.0, %v2461_v41 }
 0x27e   : > { %v1102_v37 = vmul.f32 10.0, %v1086_v22  ;;  %v1163_v50 = vmul.f32 0.1, %v1741_v43 }
 0x27f   : > { %v1132_v17 = vmul.f32 1.442695, %v1103_v44  ;;  %v1162_v19 = vmul.f32 0.1, %v1740_v47 }
 0x280   : > { %v1130_v52 = vmul.f32 1.442695, %v1102_v37  ;;  %v2089_v53 = vpop.f32.mrb[30].mxu1  ;;  %v1179_v51 = vsel %vm1067_vm9, %v3139_v60, %v1163_v50 }
 0x281   : > { %2466 = vpow2.f32 %v1132_v17  ;;  %v1055_v46 = vadd.f32 %v2089_v53, %v3113_v49  ;;  %v1049_v42 = vpop.f32.mrb[31].mxu1  ;;  %v1178_v54 = vsel %vm1066_vm8, %v3143_v0, %v1162_v19 }
 0x282   : > { %2468 = vpow2.f32 %v1130_v52  ;;  %v1050_v55 = vadd.f32 %v3113_v49, %v1049_v42  ;;  %2134 = vmatprep.mubr.f32.mxu0 %v1178_v54 }
 0x283   : > { %v2463_v56 = vpop.eup %2462  ;;  %v1089_v58 = vmin.f32 %v1055_v46, 0.0  ;;  %2135 = vmatmul.mubr.f32.gmra.mrb[40].mxu0 %v1179_v51  ;;  %vm1073_vm15 = vcmp.gt.f32.partialorder %v1055_v46, 0.0 }
 0x284   : > { %v2465_v59 = vpop.eup %2464  ;;  %v1088_v27 = vmin.f32 %v1050_v55, 0.0  ;;  %v1743_v18 = vadd.f32 -1.0, %v2463_v56  ;;  %vm1072_vm14 = vcmp.gt.f32.partialorder %v1050_v55, 0.0 }
 0x285   : > { %v1105_v63 = vmul.f32 10.0, %v1089_v58  ;;  %v1742_v1 = vadd.f32 -1.0, %v2465_v59 }
 0x286   : > { %v1104_v2 = vmul.f32 10.0, %v1088_v27  ;;  %v1165_v3 = vmul.f32 0.1, %v1743_v18 }
 0x287   : > { %v1136_v4 = vmul.f32 1.442695, %v1105_v63  ;;  %v1164_v0 = vmul.f32 0.1, %v1742_v1 }
 0x288   : > { %v1134_v6 = vmul.f32 1.442695, %v1104_v2  ;;  %v1181_v60 = vsel %vm1069_vm11, %v3150_v16, %v1165_v3 }
 0x289   : > { %2470 = vpow2.f32 %v1136_v4  ;;  %v1180_v49 = vsel %vm1068_vm10, %v3155_v21, %v1164_v0 }
 0x28a   : > { %2472 = vpow2.f32 %v1134_v6  ;;  %2137 = vmatprep.mubr.f32.mxu0 %v1180_v49 }
 0x28b   : > { %v2467_v62 = vpop.eup %2466  ;;  %2138 = vmatmul.mubr.f32.gmra.mrb[42].mxu0 %v1181_v60 }
 0x28c   : > { %v2469_v45 = vpop.eup %2468  ;;  %v1745_v7 = vadd.f32 -1.0, %v2467_v62 }
 0x28d   : > { %v1744_v11 = vadd.f32 -1.0, %v2469_v45 }
 0x28e   : > { %v1167_v12 = vmul.f32 0.1, %v1745_v7 }
 0x28f   : > { %v1166_v32 = vmul.f32 0.1, %v1744_v11 }
 0x290   : > { %v1183_v14 = vsel %vm1071_vm13, %v3162_v28, %v1167_v12 }
 0x291   : > { %v1182_v13 = vsel %vm1070_vm12, %v1040_v38, %v1166_v32 }
 0x292   : > { %2140 = vmatprep.mubr.f32.mxu0 %v1182_v13 }
 0x293   : > { %v2471_v15 = vpop.eup %2470  ;;  %2141 = vmatmul.mubr.f32.gmra.mrb[44].mxu0 %v1183_v14 }
 0x294   : > { %v2473_v20 = vpop.eup %2472  ;;  %v1747_v61 = vadd.f32 -1.0, %v2471_v15 }
 0x295   : > { %v1746_v21 = vadd.f32 -1.0, %v2473_v20 }
 0x296   : > { %v1169_v16 = vmul.f32 0.1, %v1747_v61 }
 0x297   : > { %v1168_v9 = vmul.f32 0.1, %v1746_v21 }
 0x298   : > { %v1185_v23 = vsel %vm1073_vm15, %v1055_v46, %v1169_v16 }
 0x299   : > { %v1184_v57 = vsel %vm1072_vm14, %v1050_v55, %v1168_v9 }
 0x29a   : > { %2143 = vmatprep.mubr.f32.mxu0 %v1184_v57 }
 0x29b   : > { %2144 = vmatmul.mubr.f32.gmra.mrb[46].mxu0 %v1185_v23 }
 0x336   : > { %v2124_v31 = vpop.f32.mrb[32].mxu0 }
 0x337   : > { %v1281_v33 = vadd.f32 %v2124_v31, %v3185_v29  ;;  %v1275_v5 = vpop.f32.mrb[33].mxu0 }
 0x338   : > { %v1276_v10 = vadd.f32 %v3185_v29, %v1275_v5 }
 0x339   : > { %v1371_v35 = vmin.f32 %v1281_v33, 0.0  ;;  %vm1355_vm2 = vcmp.gt.f32.partialorder %v1281_v33, 0.0 }
 0x33a   : > { %v1370_v8 = vmin.f32 %v1276_v10, 0.0  ;;  %vm1354_vm3 = vcmp.gt.f32.partialorder %v1276_v10, 0.0 }
 0x33b   : > { %v1387_v28 = vmul.f32 10.0, %v1371_v35 }
 0x33c   : > { %v1386_v36 = vmul.f32 10.0, %v1370_v8 }
 0x33d   : > { %v1404_v48 = vmul.f32 1.442695, %v1387_v28 }
 0x33e   : > { %v1402_v38 = vmul.f32 1.442695, %v1386_v36  ;;  %v2127_v34 = vpop.f32.mrb[34].mxu0 }
 0x33f   : > { %2474 = vpow2.f32 %v1404_v48  ;;  %v1291_v39 = vadd.f32 %v2127_v34, %v3185_v29  ;;  %v1285_v40 = vpop.f32.mrb[35].mxu0 }
 0x340   : > { %2476 = vpow2.f32 %v1402_v38  ;;  %v1286_v41 = vadd.f32 %v3185_v29, %v1285_v40 }
 0x341   : > { %v1373_v22 = vmin.f32 %v1291_v39, 0.0  ;;  %vm1357_vm5 = vcmp.gt.f32.partialorder %v1291_v39, 0.0 }
 0x342   : > { %v1372_v43 = vmin.f32 %v1286_v41, 0.0  ;;  %vm1356_vm6 = vcmp.gt.f32.partialorder %v1286_v41, 0.0 }
 0x343   : > { %v1389_v44 = vmul.f32 10.0, %v1373_v22 }
 0x344   : > { %v1388_v47 = vmul.f32 10.0, %v1372_v43 }
 0x345   : > { %v1408_v37 = vmul.f32 1.442695, %v1389_v44 }
 0x346   : > { %v1406_v50 = vmul.f32 1.442695, %v1388_v47  ;;  %v2130_v17 = vpop.f32.mrb[36].mxu0 }
 0x347   : > { %2478 = vpow2.f32 %v1408_v37  ;;  %v3192_v19 = vadd.f32 %v2130_v17, %v3185_v29  ;;  %v1295_v52 = vpop.f32.mrb[37].mxu0 }
 0x348   : > { %2480 = vpow2.f32 %v1406_v50  ;;  %v3195_v53 = vadd.f32 %v3185_v29, %v1295_v52 }
 0x349   : > { %v2475_v46 = vpop.eup %2474  ;;  %v1375_v42 = vmin.f32 %v3192_v19, 0.0  ;;  %vm1359_vm7 = vcmp.gt.f32.partialorder %v3192_v19, 0.0 }
 0x34a   : > { %v2477_v54 = vpop.eup %2476  ;;  %v1750_v55 = vadd.f32 -1.0, %v2475_v46  ;;  %v1374_v51 = vmin.f32 %v3195_v53, 0.0  ;;  %vm1358_vm8 = vcmp.gt.f32.partialorder %v3195_v53, 0.0 }
 0x34b   : > { %v1749_v56 = vadd.f32 -1.0, %v2477_v54  ;;  %v1391_v58 = vmul.f32 10.0, %v1375_v42 }
 0x34c   : > { %v1451_v59 = vmul.f32 0.1, %v1750_v55  ;;  %v1390_v27 = vmul.f32 10.0, %v1374_v51 }
 0x34d   : > { %v1450_v18 = vmul.f32 0.1, %v1749_v56  ;;  %v1412_v63 = vmul.f32 1.442695, %v1391_v58 }
 0x34e   : > { %v1467_v1 = vsel %vm1355_vm2, %v1281_v33, %v1451_v59  ;;  %v1410_v2 = vmul.f32 1.442695, %v1390_v27  ;;  %v2133_v3 = vpop.f32.mrb[38].mxu0 }
 0x34f   : > { %v1466_v4 = vsel %vm1354_vm3, %v1276_v10, %v1450_v18  ;;  %2482 = vpow2.f32 %v1412_v63  ;;  %v3200_v0 = vadd.f32 %v2133_v3, %v3185_v29  ;;  %v1305_v6 = vpop.f32.mrb[39].mxu0 }
 0x350   : > { %v2310_v60 = vpack.c.bf16 %v1467_v1, %v1466_v4  ;;  %2484 = vpow2.f32 %v1410_v2  ;;  %v3209_v62 = vadd.f32 %v3185_v29, %v1305_v6 }
 0x351   : > { %v2479_v45 = vpop.eup %2478  ;;  %v1377_v7 = vmin.f32 %v3200_v0, 0.0  ;;  %vm1361_vm9 = vcmp.gt.f32.partialorder %v3200_v0, 0.0 }
 0x352   : > { %v2481_v11 = vpop.eup %2480  ;;  %v1752_v12 = vadd.f32 -1.0, %v2479_v45  ;;  %v1376_v32 = vmin.f32 %v3209_v62, 0.0  ;;  %2312 = vmatpush3.bf16.xpose.msk.msra.mxu1 %vm3204_vm4, %v2310_v60  ;;  %vm1360_vm10 = vcmp.gt.f32.partialorder %v3209_v62, 0.0 }
 0x353   : > { %v1751_v13 = vadd.f32 -1.0, %v2481_v11  ;;  %v1393_v14 = vmul.f32 10.0, %v1377_v7  ;;  %2313 = vmatprep.subr.bf16.mxu1 %v2642_v30 }
 0x354   : > { %v1453_v15 = vmul.f32 0.1, %v1752_v12  ;;  %v1392_v20 = vmul.f32 10.0, %v1376_v32 }
 0x355   : > { %v1452_v61 = vmul.f32 0.1, %v1751_v13  ;;  %v1416_v21 = vmul.f32 1.442695, %v1393_v14 }
 0x356   : > { %v1469_v16 = vsel %vm1357_vm5, %v1291_v39, %v1453_v15  ;;  %v1414_v9 = vmul.f32 1.442695, %v1392_v20  ;;  %v2136_v57 = vpop.f32.mrb[40].mxu0 }
 0x357   : > { %v1468_v23 = vsel %vm1356_vm6, %v1286_v41, %v1452_v61  ;;  %2486 = vpow2.f32 %v1416_v21  ;;  %v3217_v24 = vadd.f32 %v2136_v57, %v3185_v29  ;;  %v1315_v25 = vpop.f32.mrb[41].mxu0 }
 0x358   : > { %v2314_v26 = vpack.c.bf16 %v1469_v16, %v1468_v23  ;;  %2488 = vpow2.f32 %v1414_v9  ;;  %v3220_v31 = vadd.f32 %v3185_v29, %v1315_v25 }
 0x359   : > { %v2483_v33 = vpop.eup %2482  ;;  %v1379_v5 = vmin.f32 %v3217_v24, 0.0  ;;  %vm1363_vm11 = vcmp.gt.f32.partialorder %v3217_v24, 0.0 }
 0x35a   : > { %v2485_v10 = vpop.eup %2484  ;;  %v1754_v35 = vadd.f32 -1.0, %v2483_v33  ;;  %v1378_v8 = vmin.f32 %v3220_v31, 0.0  ;;  %2316 = vmatpush3.bf16.xpose.msk.msra.mxu1 %vm3204_vm4, %v2314_v26  ;;  %vm1362_vm12 = vcmp.gt.f32.partialorder %v3220_v31, 0.0 }
 0x35b   : > { %v1753_v28 = vadd.f32 -1.0, %v2485_v10  ;;  %v1395_v36 = vmul.f32 10.0, %v1379_v5  ;;  %2317 = vmatprep.subr.bf16.mxu1 %v2642_v30 }
 0x35c   : > { %v1455_v48 = vmul.f32 0.1, %v1754_v35  ;;  %v1394_v38 = vmul.f32 10.0, %v1378_v8 }
 0x35d   : > { %v1454_v34 = vmul.f32 0.1, %v1753_v28  ;;  %v1420_v39 = vmul.f32 1.442695, %v1395_v36 }
 0x35e   : > { %v1471_v40 = vsel %vm1359_vm7, %v3192_v19, %v1455_v48  ;;  %v1418_v41 = vmul.f32 1.442695, %v1394_v38  ;;  %v2139_v22 = vpop.f32.mrb[42].mxu0 }
 0x35f   : > { %v1470_v43 = vsel %vm1358_vm8, %v3195_v53, %v1454_v34  ;;  %2490 = vpow2.f32 %v1420_v39  ;;  %v3232_v44 = vadd.f32 %v2139_v22, %v3185_v29  ;;  %v1325_v47 = vpop.f32.mrb[43].mxu0 }
 0x360   : > { %v2318_v37 = vpack.c.bf16 %v1471_v40, %v1470_v43  ;;  %2492 = vpow2.f32 %v1418_v41  ;;  %v3235_v50 = vadd.f32 %v3185_v29, %v1325_v47 }
 0x361   : > { %v2487_v17 = vpop.eup %2486  ;;  %v1381_v52 = vmin.f32 %v3232_v44, 0.0  ;;  %vm1365_vm13 = vcmp.gt.f32.partialorder %v3232_v44, 0.0 }
 0x362   : > { %v2489_v19 = vpop.eup %2488  ;;  %v1756_v46 = vadd.f32 -1.0, %v2487_v17  ;;  %v1380_v42 = vmin.f32 %v3235_v50, 0.0  ;;  %2320 = vmatpush3.bf16.xpose.msk.msra.mxu1 %vm3204_vm4, %v2318_v37  ;;  %vm1364_vm14 = vcmp.gt.f32.partialorder %v3235_v50, 0.0 }
 0x363   : > { %v1755_v53 = vadd.f32 -1.0, %v2489_v19  ;;  %v1397_v54 = vmul.f32 10.0, %v1381_v52  ;;  %2321 = vmatprep.subr.bf16.mxu1 %v2642_v30 }
 0x364   : > { %v1457_v55 = vmul.f32 0.1, %v1756_v46  ;;  %v1396_v51 = vmul.f32 10.0, %v1380_v42 }
 0x365   : > { %v1456_v56 = vmul.f32 0.1, %v1755_v53  ;;  %v1424_v58 = vmul.f32 1.442695, %v1397_v54 }
 0x366   : > { %v1473_v59 = vsel %vm1361_vm9, %v3200_v0, %v1457_v55  ;;  %v1422_v27 = vmul.f32 1.442695, %v1396_v51  ;;  %v2142_v18 = vpop.f32.mrb[44].mxu0 }
 0x367   : > { %v1472_v63 = vsel %vm1360_vm10, %v3209_v62, %v1456_v56  ;;  %2494 = vpow2.f32 %v1424_v58  ;;  %v1341_v1 = vadd.f32 %v2142_v18, %v3185_v29  ;;  %v1335_v2 = vpop.f32.mrb[45].mxu0  ;;  %v1482_v56 = vld [vmem:[%s3332_s7] sm:$0x1] }
 0x368   : > { %v2322_v3 = vpack.c.bf16 %v1473_v59, %v1472_v63  ;;  %2496 = vpow2.f32 %v1422_v27  ;;  %v1336_v4 = vadd.f32 %v3185_v29, %v1335_v2  ;;  %v1487_v27 = vpop.permute.xlu0 %1486 }
 0x369   : > { %v2491_v6 = vpop.eup %2490  ;;  %v1383_v60 = vmin.f32 %v1341_v1, 0.0  ;;  %vm1367_vm15 = vcmp.gt.f32.partialorder %v1341_v1, 0.0 }
 0x36a   : > { %v2493_v45 = vpop.eup %2492  ;;  %v1758_v7 = vadd.f32 -1.0, %v2491_v6  ;;  %v1382_v11 = vmin.f32 %v1336_v4, 0.0  ;;  %2324 = vmatpush3.bf16.xpose.msk.msra.mxu1 %vm3204_vm4, %v2322_v3  ;;  %vm1366_vm0 = vcmp.gt.f32.partialorder %v1336_v4, 0.0 }
 0x36b   : > { %v1757_v0 = vadd.f32 -1.0, %v2493_v45  ;;  %v1399_v12 = vmul.f32 10.0, %v1383_v60  ;;  %2325 = vmatprep.subr.bf16.mxu1 %v2642_v30 }
 0x36c   : > { %v1459_v62 = vmul.f32 0.1, %v1758_v7  ;;  %v1398_v32 = vmul.f32 10.0, %v1382_v11 }
 0x36d   : > { %v1458_v13 = vmul.f32 0.1, %v1757_v0  ;;  %v1428_v14 = vmul.f32 1.442695, %v1399_v12 }
 0x36e   : > { %v1475_v15 = vsel %vm1363_vm11, %v3217_v24, %v1459_v62  ;;  %v1426_v20 = vmul.f32 1.442695, %v1398_v32  ;;  %v2145_v61 = vpop.f32.mrb[46].mxu0 }
 0x36f   : > { %v1474_v21 = vsel %vm1362_vm12, %v3220_v31, %v1458_v13  ;;  %2498 = vpow2.f32 %v1428_v14  ;;  %v1351_v16 = vadd.f32 %v2145_v61, %v3185_v29  ;;  %v1345_v9 = vpop.f32.mrb[47].mxu0 }
 0x370   : > { %v2326_v57 = vpack.c.bf16 %v1475_v15, %v1474_v21  ;;  %2500 = vpow2.f32 %v1426_v20  ;;  %v1346_v23 = vadd.f32 %v3185_v29, %v1345_v9 }
 0x371   : > { %v2495_v25 = vpop.eup %2494  ;;  %v1385_v26 = vmin.f32 %v1351_v16, 0.0  ;;  %vm1369_vm2 = vcmp.gt.f32.partialorder %v1351_v16, 0.0 }
 0x372   : > { %v2497_v33 = vpop.eup %2496  ;;  %v1760_v5 = vadd.f32 -1.0, %v2495_v25  ;;  %v1384_v10 = vmin.f32 %v1346_v23, 0.0  ;;  %2328 = vmatpush3.bf16.xpose.msk.msra.mxu1 %vm3204_vm4, %v2326_v57  ;;  %vm1368_vm3 = vcmp.gt.f32.partialorder %v1346_v23, 0.0 }
 0x373   : > { %v1759_v24 = vadd.f32 -1.0, %v2497_v33  ;;  %v1401_v35 = vmul.f32 10.0, %v1385_v26  ;;  %2329 = vmatprep.subr.bf16.mxu1 %v2642_v30 }
 0x374   : > { %v1461_v31 = vmul.f32 0.1, %v1760_v5  ;;  %v1400_v8 = vmul.f32 10.0, %v1384_v10 }
 0x375   : > { %v1460_v28 = vmul.f32 0.1, %v1759_v24  ;;  %v1432_v36 = vmul.f32 1.442695, %v1401_v35 }
 0x376   : > { %v1477_v29 = vsel %vm1365_vm13, %v3232_v44, %v1461_v31  ;;  %v1430_v48 = vmul.f32 1.442695, %v1400_v8 }
 0x377   : > { %v1476_v38 = vsel %vm1364_vm14, %v3235_v50, %v1460_v28  ;;  %2502 = vpow2.f32 %v1432_v36 }
 0x378   : > { %v2330_v34 = vpack.c.bf16 %v1477_v29, %v1476_v38  ;;  %2504 = vpow2.f32 %v1430_v48 }
 0x379   : > { %v2499_v39 = vpop.eup %2498 }
 0x37a   : > { %v2501_v40 = vpop.eup %2500  ;;  %v1762_v41 = vadd.f32 -1.0, %v2499_v39  ;;  %2332 = vmatpush3.bf16.xpose.msk.msra.mxu1 %vm3204_vm4, %v2330_v34 }
 0x37b   : > { %v1761_v22 = vadd.f32 -1.0, %v2501_v40  ;;  %2333 = vmatprep.subr.bf16.mxu1 %v2642_v30 }
 0x37c   : > { %v1463_v43 = vmul.f32 0.1, %v1762_v41 }
 0x37d   : > { %v1462_v44 = vmul.f32 0.1, %v1761_v22 }
 0x37e   : > { %v1479_v47 = vsel %vm1367_vm15, %v1341_v1, %v1463_v43 }
 0x37f   : > { %v1478_v37 = vsel %vm1366_vm0, %v1336_v4, %v1462_v44 }
 0x380   : > { %v2334_v17 = vpack.c.bf16 %v1479_v47, %v1478_v37 }
 0x381   : > { %v2503_v50 = vpop.eup %2502 }
 0x382   : > { %v2505_v52 = vpop.eup %2504  ;;  %v1764_v19 = vadd.f32 -1.0, %v2503_v50  ;;  %2336 = vmatpush3.bf16.xpose.msk.msra.mxu1 %vm3204_vm4, %v2334_v17 }
 0x383   : > { %v1763_v46 = vadd.f32 -1.0, %v2505_v52  ;;  %2337 = vmatprep.subr.bf16.mxu1 %v2642_v30  ;;  %v1489_v30 = vlaneseq }
 0x384   : > { %v1465_v42 = vmul.f32 0.1, %v1764_v19 }
 0x385   : > { %v1464_v53 = vmul.f32 0.1, %v1763_v46  ;;  %v1490_v58 = vshrl.u32 %v1489_v30, 7 }
 0x386   : > { %v1481_v54 = vsel %vm1369_vm2, %v1351_v16, %v1465_v42 }
 0x387   : > { %v1480_v55 = vsel %vm1368_vm3, %v1346_v23, %v1464_v53  ;;  %v1491_v59 = vsub.s32 0, %v1490_v58 }
 0x388   : > { %v2338_v51 = vpack.c.bf16 %v1481_v54, %v1480_v55 }
 0x389   : > { %v1492_v18 = vrot.slane %v1487_v27, %v1491_v59 }
 0x38a   : > { %2340 = vmatpush3.bf16.xpose.msk.msra.mxu1 %vm3204_vm4, %v2338_v51 }
 0x391   : > { %2179 = vmatmul.mubr.msk.f32.vlgmr.msra.gmra.mrb[32].mxu1 %vm1493_vm1, %v1482_v56 }
 0x464   : > { %v1611_v63 = vpop.f32.mrb[32].mxu1 }
 0x465   : > { %v1612_v1 = vadd.f32 %v1611_v63, %v1492_v18  ;;  %v2180_v49 = vpop.f32.mrb[33].mxu1 }
 0x467   : > { %1615 = vst [vmem:[%s367_s20] sm:$0x1] %v1612_v1 }
 0x468   : > { %2577 = shalt.err (!%p2574_p7)
}
 0x469   : > { %s2578_s27 = scalar_lea.hbm %s3281_s23, 16  ;;  %s2582_s16 = scalar_lea.hbm %s3334_s9, 32 }
 0x46a   : > { %p2579_p9 = scmp.ne.s32.totalorder %s3281_s23, %s2578_s27  ;;  %p2583_p5 = scmp.lt.u32.totalorder %s3281_s23, %s3334_s9 }
 0x46b   : > { %p2584_p11 = scmp.lt.u32.totalorder %s2582_s16, %s2578_s27  ;;  %p2586_p4 = scmp.lt.u32.totalorder %s2578_s27, %s3281_s23 }
 0x46c   : > { %p2580_p2 = pnand %p2579_p9, %p2791_p12 }
 0x46d   : > { %p2585_p1 = por %p2584_p11, %p2583_p5 }
 0x46e   : > { %p2581_p0 = pneg %p2580_p2 }
 0x46f   : > { %p2587_p6 = por %p2586_p4, %p2585_p1 }
 0x471   : > { %p2588_p8 = pnand %p2587_p6, %p2581_p0 }
 0x473   : > { %2591 = shalt.err (!%p2588_p8)
}
 0x474   : > { %2350 = dma.vmem_to_hbm [thread:$0]  (%p2791_p12), %s3283_s24, 16, %s3281_s23, %s1617_s1  }
 0x475 PF: > { %s1641_s20 = sand.u32 1, %s2622_s11   ;;  %p3356_p10 = scmp.ne.s32.totalorder %s3342_s17, 0 }
 0x476   : > { %p3357_p13 = scmp.ge.s32.totalorder %s2634_s14, 2  ;;  %s1642_s19 = scalar_lea.sflag [#allocation5], %s1641_s20 }
 0x478   : > { %p2361_p3 = pnand %p3357_p13, %p3356_p10 }
 0x47a   : > { %2617 = dma.done.wait (!%p2361_p3), %s1642_s19, 16  }
 0x47b   : > { %2619 = vsyncadd (!%p2361_p3), %s1642_s19, 4294967280  ;;  %s3358_s14 = sld [smem:[#allocation12_spill]]  ;;  %s3359_s11 = smov %s2626_s12 }
 0x47c   : > { %s3360_s12 = smov %s2630_s13  ;;  %s3361_s13 = smov %s2787_s28 }
 0x481   : > { %p25_p7 = scmp.ge.s32.totalorder %s3358_s14, 4  }
 0x483   :  { %27 = sbr.rel (!%p25_p7) target bundleno = 9 (0x9), region = 105 }
 0x48a   :  { %1646 = vsyncpa [#allocation4], 1 }
 0x48b   :  { %1648 = vsyncpa [#allocation4 + $0x1], 1 }
 0x48c   :  { %1649 = vsyncpa [#allocation7], 1 }
 0x48d   :  { %1650 = vsyncpa [#allocation5], 1 }
 0x48e   :  { %1652 = vsyncpa [#allocation5 + $0x1], 1 }

</bundles_post_ra>
